<compile_context>
chip_gen: v7x
topology: tpu7x:2x2x1
jax: 0.10.0
libtpu: 0.0.40
codegen_flags: <defaults>
</compile_context>

<pallas_src>
import functools

import jax
import jax.numpy as jnp
import numpy as np
from jax.experimental import pallas as pl
from jax.experimental.pallas import tpu as pltpu


# ----------------------------------------------------------------------------
# In-kernel GroupNorm on a lane-folded, batch-folded slab (block_n*H, W*C).
# Per-sample statistics via ONE precomputed projection P = gather@scatter/count.
# All math f32.
# ----------------------------------------------------------------------------
def _gn_batched(y, gamma, beta, p_mat, *, block_n, h, eps):
    # y: (block_n*h, W*C) f32 ; gamma/beta: (1, W*C) ; p_mat: (W*C, W*C)
    wc = y.shape[-1]
    y3 = y.reshape(block_n, h, wc)
    s = jnp.sum(y3, axis=1)                                        # (bn, W*C)
    mean_l = jnp.dot(s, p_mat, preferred_element_type=jnp.float32)  # (bn, W*C)
    d = y3 - mean_l[:, None, :]
    q = jnp.sum(d * d, axis=1)                                     # (bn, W*C)
    var_l = jnp.dot(q, p_mat, preferred_element_type=jnp.float32)
    inv_l = jax.lax.rsqrt(var_l + eps)                             # (bn, W*C)
    out = d * (inv_l[:, None, :] * gamma) + beta
    return out.reshape(block_n * h, wc)


# ----------------------------------------------------------------------------
# Fused IdentityBlock kernel: block_n samples per grid step, all in VMEM.
# ----------------------------------------------------------------------------
def _identity_block_kernel(x_ref, w1_ref, w2_ref, w3_ref, v12_ref, v3_ref,
                           pf_ref, po_ref, mask_ref, o_ref,
                           *, block_n, h, eps):
    m = block_n * h
    x = x_ref[...].reshape(m, x_ref.shape[-1]).astype(jnp.bfloat16)

    # ---- stage 1: 1x1 conv (block-diag bf16 matmul) + GroupNorm + ReLU -----
    y = jnp.dot(x, w1_ref[...], preferred_element_type=jnp.float32)
    y = y + v12_ref[0:1, :]
    y = _gn_batched(y, v12_ref[1:2, :], v12_ref[2:3, :], pf_ref[...],
                    block_n=block_n, h=h, eps=eps)
    y = jnp.maximum(y, 0.0)

    # ---- stage 2: 3x3 conv (pad=1) as 3 accumulating dots + GroupNorm ------
    # Row (dh) shifts via sublane rolls + host-precomputed edge masks; the dw
    # shifts and zero padding along W are folded into the kh weight blocks.
    mu = mask_ref[:, 0:1]                                   # zero where h == 0
    md = mask_ref[:, 1:2]                                   # zero where h == H-1
    up = (pltpu.roll(y, 1, axis=0) * mu).astype(jnp.bfloat16)       # y[h-1]
    dn = (pltpu.roll(y, m - 1, axis=0) * md).astype(jnp.bfloat16)   # y[h+1]
    yb = y.astype(jnp.bfloat16)
    y = (jnp.dot(up, w2_ref[0], preferred_element_type=jnp.float32)
         + jnp.dot(yb, w2_ref[1], preferred_element_type=jnp.float32)
         + jnp.dot(dn, w2_ref[2], preferred_element_type=jnp.float32))
    y = y + v12_ref[3:4, :]
    y = _gn_batched(y, v12_ref[4:5, :], v12_ref[5:6, :], pf_ref[...],
                    block_n=block_n, h=h, eps=eps)

    # ---- stage 3: 1x1 conv + GroupNorm (no relu / no residual, per spec) ---
    y = jnp.dot(y.astype(jnp.bfloat16), w3_ref[...],
                preferred_element_type=jnp.float32)
    y = y + v3_ref[0:1, :]
    y = _gn_batched(y, v3_ref[1:2, :], v3_ref[2:3, :], po_ref[...],
                    block_n=block_n, h=h, eps=eps)

    o_ref[...] = y.reshape(block_n, h, o_ref.shape[-1]).astype(o_ref.dtype)


# ----------------------------------------------------------------------------
# Host-side folding (numpy, run ONCE per layer, outside jit).
# ----------------------------------------------------------------------------
def _fold_vec(v, w):
    # (C,) -> (1, W*C): value v[c] at lane w_i*C + c
    return np.tile(np.asarray(v, np.float32), w).reshape(1, -1)


def _block_diag_1x1(wmat, w):
    # (Cin, Cout) -> (W*Cin, W*Cout), block diagonal (per-pixel 1x1 conv).
    return np.kron(np.eye(w, dtype=np.float32), np.asarray(wmat, np.float32))


def _tridiag_3x3_blocks(w2, w):
    # w2: (3, 3, Cin, Cout) HWIO -> (3, W*Cin, W*Cout): one block per kh tap.
    # Each block is block-tridiagonal over W: the shifted identity folds the
    # dw tap and the zero padding along W directly into the weight.
    w2 = np.asarray(w2, np.float32)
    blocks = []
    for kh in range(3):
        blk = sum(np.kron(np.eye(w, k=1 - kw, dtype=np.float32), w2[kh, kw])
                  for kw in range(3))
        blocks.append(blk)
    return np.stack(blocks, axis=0)


def _gn_projection(c, groups, w, h):
    # Fused gather/scatter projection P = m_cg @ m_gc / count, (W*C, W*C).
    lanes = np.arange(w * c)
    grp = (lanes % c) // (c // groups)
    m_cg = (grp[:, None] == np.arange(groups)[None, :]).astype(np.float32)
    count = float(h * w * (c // groups))
    return (m_cg @ m_cg.T) / count


def fold_identity_block_params(p, h, w, *, num_groups=8):
    """Build layer constants once (host-side); cache and reuse across calls."""
    f = int(p["w1"].shape[1])
    fout = int(p["w3"].shape[1])
    bf16 = jnp.bfloat16
    return {
        "w1": jnp.asarray(_block_diag_1x1(p["w1"], w)).astype(bf16),
        "w2": jnp.asarray(_tridiag_3x3_blocks(p["w2"], w)).astype(bf16),
        "w3": jnp.asarray(_block_diag_1x1(p["w3"], w)).astype(bf16),
        "v12": jnp.asarray(np.concatenate(
            [_fold_vec(p["b1"], w), _fold_vec(p["g1"], w),
             _fold_vec(p["be1"], w), _fold_vec(p["b2"], w),
             _fold_vec(p["g2"], w), _fold_vec(p["be2"], w)], axis=0)),
        "v3": jnp.asarray(np.concatenate(
            [_fold_vec(p["b3"], w), _fold_vec(p["g3"], w),
             _fold_vec(p["be3"], w)], axis=0)),
        "pf": jnp.asarray(_gn_projection(f, num_groups, w, h)),
        "po": jnp.asarray(_gn_projection(fout, num_groups, w, h)),
    }


# ----------------------------------------------------------------------------
# IdentityBlock forward (strides=(1,1) path), NCHW in / NCHW out.
# NOTE: the NCHW <-> (N,H,W*C) transposes stay only because the PyTorch spec
# is NCHW; in a fused ResNet, carry the lane-folded layout between blocks.
# ----------------------------------------------------------------------------
def identity_block_forward(x_nchw, folded, *, block_n=None, eps=1e-5):
    n, cin, h, w = x_nchw.shape
    wcin = w * cin
    wf = folded["w1"].shape[1]
    wfout = folded["w3"].shape[1]

    if block_n is None:
        block_n = n          # one fat step; on v7x use n//2 for 2 TC parallel
    assert n % block_n == 0

    # NCHW -> lane-folded (N, H, W*Cin)
    x = jnp.transpose(x_nchw, (0, 2, 3, 1)).reshape(n, h, wcin)

    # Row-shift edge masks for the 3x3 conv (compile-time constant).
    rows = np.arange(block_n * h)
    masks = jnp.asarray(np.stack([(rows % h) >= 1, (rows % h) <= h - 2],
                                 axis=1).astype(np.float32))

    kern = functools.partial(_identity_block_kernel,
                             block_n=block_n, h=h, eps=eps)

    def full_spec(arr):
        nd = arr.ndim
        return pl.BlockSpec(arr.shape, lambda i, _nd=nd: (0,) * _nd)

    # Advisory cost estimate (the folded 1x1s do W-x the logical conv flops).
    r = n * h
    flops = (2 * r * wcin * wf            # stage 1
             + 3 * 2 * r * wf * wf        # stage 2 (3 kh taps)
             + 2 * r * wf * wfout         # stage 3
             + 2 * (2 * 2 * n * wf * wf + 2 * n * wfout * wfout))  # GN stats
    transcendentals = n * (2 * wf + wfout)
    bytes_accessed = (4 * (x.size + n * h * wfout)
                      + 2 * (folded["w1"].size + folded["w2"].size
                             + folded["w3"].size)
                      + 4 * (folded["pf"].size + folded["po"].size
                             + folded["v12"].size + folded["v3"].size
                             + masks.size))

    out_folded = pl.pallas_call(
        kern,
        out_shape=jax.ShapeDtypeStruct((n, h, wfout), jnp.float32),
        grid=(n // block_n,),
        in_specs=[
            pl.BlockSpec((block_n, h, wcin), lambda i: (i, 0, 0)),
            full_spec(folded["w1"]), full_spec(folded["w2"]),
            full_spec(folded["w3"]), full_spec(folded["v12"]),
            full_spec(folded["v3"]), full_spec(folded["pf"]),
            full_spec(folded["po"]), full_spec(masks),
        ],
        out_specs=pl.BlockSpec((block_n, h, wfout), lambda i: (i, 0, 0)),
        compiler_params=pltpu.CompilerParams(
            dimension_semantics=("parallel",)),
        cost_estimate=pl.CostEstimate(flops=int(flops),
                                      transcendentals=int(transcendentals),
                                      bytes_accessed=int(bytes_accessed)),
    )(x, folded["w1"], folded["w2"], folded["w3"], folded["v12"],
      folded["v3"], folded["pf"], folded["po"], masks)

    fout = wfout // w
    return jnp.transpose(out_folded.reshape(n, h, w, fout), (0, 3, 1, 2))


# ----------------------------------------------------------------------------
# Pure-JAX f32 reference (sanity check of the Pallas kernel).
# ----------------------------------------------------------------------------
def _reference(x, p, num_groups=8, eps=1e-5):
    def gn(y, gamma, beta):
        n, c, h, w = y.shape
        yg = y.reshape(n, num_groups, c // num_groups, h, w)
        m = yg.mean(axis=(2, 3, 4), keepdims=True)
        v = yg.var(axis=(2, 3, 4), keepdims=True)
        yn = ((yg - m) / jnp.sqrt(v + eps)).reshape(n, c, h, w)
        return yn * gamma.reshape(1, c, 1, 1) + beta.reshape(1, c, 1, 1)

    def conv1x1(x, w, b):
        return jnp.einsum("nchw,cd->ndhw", x, w) + b.reshape(1, -1, 1, 1)

    def conv3x3(x, w, b):
        y = jax.lax.conv_general_dilated(
            x, w, (1, 1), "SAME", dimension_numbers=("NCHW", "HWIO", "NCHW"))
        return y + b.reshape(1, -1, 1, 1)

    x1 = jax.nn.relu(gn(conv1x1(x, p["w1"], p["b1"]), p["g1"], p["be1"]))
    x2 = gn(conv3x3(x1, p["w2"], p["b2"]), p["g2"], p["be2"])
    x3 = gn(conv1x1(x2, p["w3"], p["b3"]), p["g3"], p["be3"])
    return x3


if __name__ == "__main__":
    # IdentityBlock(input_size=16, filters=16, filters_out=32, strides=(1,1))
    N, Cin, H, W = 2, 16, 8, 8
    F, Fout = 16, 32

    key = jax.random.PRNGKey(0)
    ks = jax.random.split(key, 8)
    params = {
        "w1": 0.25 * jax.random.normal(ks[0], (Cin, F), jnp.float32),
        "b1": 0.10 * jax.random.normal(ks[1], (F,), jnp.float32),
        "g1": 1.0 + 0.1 * jax.random.normal(ks[2], (F,), jnp.float32),
        "be1": 0.1 * jax.random.normal(ks[3], (F,), jnp.float32),
        "w2": 0.10 * jax.random.normal(ks[4], (3, 3, F, F), jnp.float32),
        "b2": 0.10 * jax.random.normal(ks[5], (F,), jnp.float32),
        "g2": jnp.ones((F,), jnp.float32),
        "be2": jnp.zeros((F,), jnp.float32),
        "w3": 0.25 * jax.random.normal(ks[6], (F, Fout), jnp.float32),
        "b3": 0.10 * jax.random.normal(ks[7], (Fout,), jnp.float32),
        "g3": jnp.ones((Fout,), jnp.float32),
        "be3": jnp.zeros((Fout,), jnp.float32),
    }

    x = jax.random.normal(jax.random.PRNGKey(42), (N, Cin, H, W), jnp.float32)

    # Fold layer constants ONCE (host-side), then jit the forward.
    folded = fold_identity_block_params(params, H, W, num_groups=8)
    fwd = jax.jit(identity_block_forward)

    out = jax.block_until_ready(fwd(x, folded))
    ref = jax.block_until_ready(_reference(x, params))

    assert out.shape == (N, Fout, H, W)
    # bf16 matmul operands (f32 accumulation / GroupNorm) -> loosened tolerance
    np.testing.assert_allclose(np.asarray(out), np.asarray(ref),
                               rtol=5e-2, atol=5e-2)
    print("KERNEL_OK")
</pallas_src>

<mosaic_0001>
module attributes {stable_mosaic.version = 11 : i64} {
  func.func @_identity_block_kernel(%arg0: i32, %arg1: memref<2x8x128xf32, #tpu.memory_space<vmem>>, %arg2: memref<128x128xbf16, #tpu.memory_space<vmem>>, %arg3: memref<3x128x128xbf16, #tpu.memory_space<vmem>>, %arg4: memref<128x256xbf16, #tpu.memory_space<vmem>>, %arg5: memref<6x128xf32, #tpu.memory_space<vmem>>, %arg6: memref<3x256xf32, #tpu.memory_space<vmem>>, %arg7: memref<128x128xf32, #tpu.memory_space<vmem>>, %arg8: memref<256x256xf32, #tpu.memory_space<vmem>>, %arg9: memref<16x2xf32, #tpu.memory_space<vmem>>, %arg10: memref<2x8x256xf32, #tpu.memory_space<vmem>>) attributes {dimension_semantics = [#tpu.dimension_semantics<parallel>], iteration_bounds = array<i64: 1>, scalar_prefetch = 0 : i64, scratch_operands = 0 : i64, tpu.core_type = #tpu.core_type<tc>, window_params = [{transform_indices = @transform_0, window_bounds = array<i64: 2, 8, 128>}, {pipeline_mode = #tpu.pipeline_mode<synchronous>, transform_indices = @transform_1, window_bounds = array<i64: 128, 128>}, {pipeline_mode = #tpu.pipeline_mode<synchronous>, transform_indices = @transform_2, window_bounds = array<i64: 3, 128, 128>}, {pipeline_mode = #tpu.pipeline_mode<synchronous>, transform_indices = @transform_3, window_bounds = array<i64: 128, 256>}, {pipeline_mode = #tpu.pipeline_mode<synchronous>, transform_indices = @transform_4, window_bounds = array<i64: 6, 128>}, {pipeline_mode = #tpu.pipeline_mode<synchronous>, transform_indices = @transform_5, window_bounds = array<i64: 3, 256>}, {pipeline_mode = #tpu.pipeline_mode<synchronous>, transform_indices = @transform_6, window_bounds = array<i64: 128, 128>}, {pipeline_mode = #tpu.pipeline_mode<synchronous>, transform_indices = @transform_7, window_bounds = array<i64: 256, 256>}, {pipeline_mode = #tpu.pipeline_mode<synchronous>, transform_indices = @transform_8, window_bounds = array<i64: 16, 2>}, {transform_indices = @transform_9, window_bounds = array<i64: 2, 8, 256>}]} {
    %c0 = arith.constant 0 : index
    %c0_0 = arith.constant 0 : index
    %c0_1 = arith.constant 0 : index
    %0 = vector.load %arg1[%c0, %c0_0, %c0_1] : memref<2x8x128xf32, #tpu.memory_space<vmem>>, vector<2x8x128xf32>
    %1 = vector.shape_cast %0 : vector<2x8x128xf32> to vector<16x128xf32>
    %2 = arith.truncf %1 : vector<16x128xf32> to vector<16x128xbf16>
    %c0_2 = arith.constant 0 : index
    %c0_3 = arith.constant 0 : index
    %3 = vector.load %arg2[%c0_2, %c0_3] : memref<128x128xbf16, #tpu.memory_space<vmem>>, vector<128x128xbf16>
    %cst = arith.constant dense<0.000000e+00> : vector<16x128xf32>
    %4 = tpu.matmul %2, %3, %cst {dimension_numbers = #tpu.dot_dimension_numbers<[1], [0], [0], [1], [0, 0, 1, 1], [], []>} : vector<16x128xbf16>, vector<128x128xbf16>, vector<16x128xf32> -> vector<16x128xf32>
    %c0_4 = arith.constant 0 : index
    %c0_5 = arith.constant 0 : index
    %5 = vector.load %arg5[%c0_4, %c0_5] : memref<6x128xf32, #tpu.memory_space<vmem>>, vector<1x128xf32>
    %6 = vector.broadcast %5 : vector<1x128xf32> to vector<16x128xf32>
    %7 = arith.addf %4, %6 : vector<16x128xf32>
    %c1 = arith.constant 1 : index
    %c0_6 = arith.constant 0 : index
    %8 = vector.load %arg5[%c1, %c0_6] : memref<6x128xf32, #tpu.memory_space<vmem>>, vector<1x128xf32>
    %c2 = arith.constant 2 : index
    %c0_7 = arith.constant 0 : index
    %9 = vector.load %arg5[%c2, %c0_7] : memref<6x128xf32, #tpu.memory_space<vmem>>, vector<1x128xf32>
    %c0_8 = arith.constant 0 : index
    %c0_9 = arith.constant 0 : index
    %10 = vector.load %arg7[%c0_8, %c0_9] : memref<128x128xf32, #tpu.memory_space<vmem>>, vector<128x128xf32>
    %11 = vector.shape_cast %7 : vector<16x128xf32> to vector<2x8x128xf32>
    %cst_10 = arith.constant dense<0.000000e+00> : vector<2x128xf32>
    %12 = vector.multi_reduction <add>, %11, %cst_10 [1] : vector<2x8x128xf32> to vector<2x128xf32>
    %cst_11 = arith.constant dense<0.000000e+00> : vector<2x128xf32>
    %13 = tpu.matmul %12, %10, %cst_11 {dimension_numbers = #tpu.dot_dimension_numbers<[1], [0], [0], [1], [0, 0, 1, 1], [], []>} : vector<2x128xf32>, vector<128x128xf32>, vector<2x128xf32> -> vector<2x128xf32>
    %14 = vector.shape_cast %13 : vector<2x128xf32> to vector<2x1x128xf32>
    %15 = vector.broadcast %14 : vector<2x1x128xf32> to vector<2x8x128xf32>
    %16 = arith.subf %11, %15 : vector<2x8x128xf32>
    %17 = arith.mulf %16, %16 : vector<2x8x128xf32>
    %cst_12 = arith.constant dense<0.000000e+00> : vector<2x128xf32>
    %18 = vector.multi_reduction <add>, %17, %cst_12 [1] : vector<2x8x128xf32> to vector<2x128xf32>
    %cst_13 = arith.constant dense<0.000000e+00> : vector<2x128xf32>
    %19 = tpu.matmul %18, %10, %cst_13 {dimension_numbers = #tpu.dot_dimension_numbers<[1], [0], [0], [1], [0, 0, 1, 1], [], []>} : vector<2x128xf32>, vector<128x128xf32>, vector<2x128xf32> -> vector<2x128xf32>
    %cst_14 = arith.constant 9.99999974E-6 : f32
    %20 = vector.broadcast %cst_14 : f32 to vector<2x128xf32>
    %21 = arith.addf %19, %20 : vector<2x128xf32>
    %22 = math.rsqrt %21 : vector<2x128xf32>
    %23 = vector.shape_cast %22 : vector<2x128xf32> to vector<2x1x128xf32>
    %24 = vector.shape_cast %8 : vector<1x128xf32> to vector<1x1x128xf32>
    %25 = vector.broadcast %24 : vector<1x1x128xf32> to vector<2x1x128xf32>
    %26 = arith.mulf %23, %25 : vector<2x1x128xf32>
    %27 = vector.broadcast %26 : vector<2x1x128xf32> to vector<2x8x128xf32>
    %28 = arith.mulf %16, %27 : vector<2x8x128xf32>
    %29 = vector.shape_cast %9 : vector<1x128xf32> to vector<1x1x128xf32>
    %30 = vector.broadcast %29 : vector<1x1x128xf32> to vector<2x8x128xf32>
    %31 = arith.addf %28, %30 : vector<2x8x128xf32>
    %32 = vector.shape_cast %31 : vector<2x8x128xf32> to vector<16x128xf32>
    %cst_15 = arith.constant 0.000000e+00 : f32
    %33 = vector.broadcast %cst_15 : f32 to vector<16x128xf32>
    %34 = arith.maximumf %32, %33 : vector<16x128xf32>
    %c0_16 = arith.constant 0 : index
    %c0_17 = arith.constant 0 : index
    %35 = vector.load %arg9[%c0_16, %c0_17] : memref<16x2xf32, #tpu.memory_space<vmem>>, vector<16x1xf32>
    %c0_18 = arith.constant 0 : index
    %c1_19 = arith.constant 1 : index
    %36 = vector.load %arg9[%c0_18, %c1_19] : memref<16x2xf32, #tpu.memory_space<vmem>>, vector<16x1xf32>
    %c1_i32 = arith.constant 1 : i32
    %37 = tpu.dynamic_rotate %34 by %c1_i32 dim 0 : vector<16x128xf32>, i32 -> vector<16x128xf32>
    %38 = vector.broadcast %35 : vector<16x1xf32> to vector<16x128xf32>
    %39 = arith.mulf %37, %38 : vector<16x128xf32>
    %40 = arith.truncf %39 : vector<16x128xf32> to vector<16x128xbf16>
    %c15_i32 = arith.constant 15 : i32
    %41 = tpu.dynamic_rotate %34 by %c15_i32 dim 0 : vector<16x128xf32>, i32 -> vector<16x128xf32>
    %42 = vector.broadcast %36 : vector<16x1xf32> to vector<16x128xf32>
    %43 = arith.mulf %41, %42 : vector<16x128xf32>
    %44 = arith.truncf %43 : vector<16x128xf32> to vector<16x128xbf16>
    %45 = arith.truncf %34 : vector<16x128xf32> to vector<16x128xbf16>
    %c0_20 = arith.constant 0 : index
    %c0_21 = arith.constant 0 : index
    %c0_22 = arith.constant 0 : index
    %46 = vector.load %arg3[%c0_20, %c0_21, %c0_22] : memref<3x128x128xbf16, #tpu.memory_space<vmem>>, vector<1x128x128xbf16>
    %47 = vector.shape_cast %46 : vector<1x128x128xbf16> to vector<128x128xbf16>
    %cst_23 = arith.constant dense<0.000000e+00> : vector<16x128xf32>
    %48 = tpu.matmul %40, %47, %cst_23 {dimension_numbers = #tpu.dot_dimension_numbers<[1], [0], [0], [1], [0, 0, 1, 1], [], []>} : vector<16x128xbf16>, vector<128x128xbf16>, vector<16x128xf32> -> vector<16x128xf32>
    %c1_24 = arith.constant 1 : index
    %c0_25 = arith.constant 0 : index
    %c0_26 = arith.constant 0 : index
    %49 = vector.load %arg3[%c1_24, %c0_25, %c0_26] : memref<3x128x128xbf16, #tpu.memory_space<vmem>>, vector<1x128x128xbf16>
    %50 = vector.shape_cast %49 : vector<1x128x128xbf16> to vector<128x128xbf16>
    %cst_27 = arith.constant dense<0.000000e+00> : vector<16x128xf32>
    %51 = tpu.matmul %45, %50, %cst_27 {dimension_numbers = #tpu.dot_dimension_numbers<[1], [0], [0], [1], [0, 0, 1, 1], [], []>} : vector<16x128xbf16>, vector<128x128xbf16>, vector<16x128xf32> -> vector<16x128xf32>
    %52 = arith.addf %48, %51 : vector<16x128xf32>
    %c2_28 = arith.constant 2 : index
    %c0_29 = arith.constant 0 : index
    %c0_30 = arith.constant 0 : index
    %53 = vector.load %arg3[%c2_28, %c0_29, %c0_30] : memref<3x128x128xbf16, #tpu.memory_space<vmem>>, vector<1x128x128xbf16>
    %54 = vector.shape_cast %53 : vector<1x128x128xbf16> to vector<128x128xbf16>
    %cst_31 = arith.constant dense<0.000000e+00> : vector<16x128xf32>
    %55 = tpu.matmul %44, %54, %cst_31 {dimension_numbers = #tpu.dot_dimension_numbers<[1], [0], [0], [1], [0, 0, 1, 1], [], []>} : vector<16x128xbf16>, vector<128x128xbf16>, vector<16x128xf32> -> vector<16x128xf32>
    %56 = arith.addf %52, %55 : vector<16x128xf32>
    %c3 = arith.constant 3 : index
    %c0_32 = arith.constant 0 : index
    %57 = vector.load %arg5[%c3, %c0_32] : memref<6x128xf32, #tpu.memory_space<vmem>>, vector<1x128xf32>
    %58 = vector.broadcast %57 : vector<1x128xf32> to vector<16x128xf32>
    %59 = arith.addf %56, %58 : vector<16x128xf32>
    %c4 = arith.constant 4 : index
    %c0_33 = arith.constant 0 : index
    %60 = vector.load %arg5[%c4, %c0_33] : memref<6x128xf32, #tpu.memory_space<vmem>>, vector<1x128xf32>
    %c5 = arith.constant 5 : index
    %c0_34 = arith.constant 0 : index
    %61 = vector.load %arg5[%c5, %c0_34] : memref<6x128xf32, #tpu.memory_space<vmem>>, vector<1x128xf32>
    %c0_35 = arith.constant 0 : index
    %c0_36 = arith.constant 0 : index
    %62 = vector.load %arg7[%c0_35, %c0_36] : memref<128x128xf32, #tpu.memory_space<vmem>>, vector<128x128xf32>
    %63 = vector.shape_cast %59 : vector<16x128xf32> to vector<2x8x128xf32>
    %cst_37 = arith.constant dense<0.000000e+00> : vector<2x128xf32>
    %64 = vector.multi_reduction <add>, %63, %cst_37 [1] : vector<2x8x128xf32> to vector<2x128xf32>
    %cst_38 = arith.constant dense<0.000000e+00> : vector<2x128xf32>
    %65 = tpu.matmul %64, %62, %cst_38 {dimension_numbers = #tpu.dot_dimension_numbers<[1], [0], [0], [1], [0, 0, 1, 1], [], []>} : vector<2x128xf32>, vector<128x128xf32>, vector<2x128xf32> -> vector<2x128xf32>
    %66 = vector.shape_cast %65 : vector<2x128xf32> to vector<2x1x128xf32>
    %67 = vector.broadcast %66 : vector<2x1x128xf32> to vector<2x8x128xf32>
    %68 = arith.subf %63, %67 : vector<2x8x128xf32>
    %69 = arith.mulf %68, %68 : vector<2x8x128xf32>
    %cst_39 = arith.constant dense<0.000000e+00> : vector<2x128xf32>
    %70 = vector.multi_reduction <add>, %69, %cst_39 [1] : vector<2x8x128xf32> to vector<2x128xf32>
    %cst_40 = arith.constant dense<0.000000e+00> : vector<2x128xf32>
    %71 = tpu.matmul %70, %62, %cst_40 {dimension_numbers = #tpu.dot_dimension_numbers<[1], [0], [0], [1], [0, 0, 1, 1], [], []>} : vector<2x128xf32>, vector<128x128xf32>, vector<2x128xf32> -> vector<2x128xf32>
    %cst_41 = arith.constant 9.99999974E-6 : f32
    %72 = vector.broadcast %cst_41 : f32 to vector<2x128xf32>
    %73 = arith.addf %71, %72 : vector<2x128xf32>
    %74 = math.rsqrt %73 : vector<2x128xf32>
    %75 = vector.shape_cast %74 : vector<2x128xf32> to vector<2x1x128xf32>
    %76 = vector.shape_cast %60 : vector<1x128xf32> to vector<1x1x128xf32>
    %77 = vector.broadcast %76 : vector<1x1x128xf32> to vector<2x1x128xf32>
    %78 = arith.mulf %75, %77 : vector<2x1x128xf32>
    %79 = vector.broadcast %78 : vector<2x1x128xf32> to vector<2x8x128xf32>
    %80 = arith.mulf %68, %79 : vector<2x8x128xf32>
    %81 = vector.shape_cast %61 : vector<1x128xf32> to vector<1x1x128xf32>
    %82 = vector.broadcast %81 : vector<1x1x128xf32> to vector<2x8x128xf32>
    %83 = arith.addf %80, %82 : vector<2x8x128xf32>
    %84 = vector.shape_cast %83 : vector<2x8x128xf32> to vector<16x128xf32>
    %85 = arith.truncf %84 : vector<16x128xf32> to vector<16x128xbf16>
    %c0_42 = arith.constant 0 : index
    %c0_43 = arith.constant 0 : index
    %86 = vector.load %arg4[%c0_42, %c0_43] : memref<128x256xbf16, #tpu.memory_space<vmem>>, vector<128x256xbf16>
    %cst_44 = arith.constant dense<0.000000e+00> : vector<16x256xf32>
    %87 = tpu.matmul %85, %86, %cst_44 {dimension_numbers = #tpu.dot_dimension_numbers<[1], [0], [0], [1], [0, 0, 1, 1], [], []>} : vector<16x128xbf16>, vector<128x256xbf16>, vector<16x256xf32> -> vector<16x256xf32>
    %c0_45 = arith.constant 0 : index
    %c0_46 = arith.constant 0 : index
    %88 = vector.load %arg6[%c0_45, %c0_46] : memref<3x256xf32, #tpu.memory_space<vmem>>, vector<1x256xf32>
    %89 = vector.broadcast %88 : vector<1x256xf32> to vector<16x256xf32>
    %90 = arith.addf %87, %89 : vector<16x256xf32>
    %c1_47 = arith.constant 1 : index
    %c0_48 = arith.constant 0 : index
    %91 = vector.load %arg6[%c1_47, %c0_48] : memref<3x256xf32, #tpu.memory_space<vmem>>, vector<1x256xf32>
    %c2_49 = arith.constant 2 : index
    %c0_50 = arith.constant 0 : index
    %92 = vector.load %arg6[%c2_49, %c0_50] : memref<3x256xf32, #tpu.memory_space<vmem>>, vector<1x256xf32>
    %c0_51 = arith.constant 0 : index
    %c0_52 = arith.constant 0 : index
    %93 = vector.load %arg8[%c0_51, %c0_52] : memref<256x256xf32, #tpu.memory_space<vmem>>, vector<256x256xf32>
    %94 = vector.shape_cast %90 : vector<16x256xf32> to vector<2x8x256xf32>
    %cst_53 = arith.constant dense<0.000000e+00> : vector<2x256xf32>
    %95 = vector.multi_reduction <add>, %94, %cst_53 [1] : vector<2x8x256xf32> to vector<2x256xf32>
    %cst_54 = arith.constant dense<0.000000e+00> : vector<2x256xf32>
    %96 = tpu.matmul %95, %93, %cst_54 {dimension_numbers = #tpu.dot_dimension_numbers<[1], [0], [0], [1], [0, 0, 1, 1], [], []>} : vector<2x256xf32>, vector<256x256xf32>, vector<2x256xf32> -> vector<2x256xf32>
    %97 = vector.shape_cast %96 : vector<2x256xf32> to vector<2x1x256xf32>
    %98 = vector.broadcast %97 : vector<2x1x256xf32> to vector<2x8x256xf32>
    %99 = arith.subf %94, %98 : vector<2x8x256xf32>
    %100 = arith.mulf %99, %99 : vector<2x8x256xf32>
    %cst_55 = arith.constant dense<0.000000e+00> : vector<2x256xf32>
    %101 = vector.multi_reduction <add>, %100, %cst_55 [1] : vector<2x8x256xf32> to vector<2x256xf32>
    %cst_56 = arith.constant dense<0.000000e+00> : vector<2x256xf32>
    %102 = tpu.matmul %101, %93, %cst_56 {dimension_numbers = #tpu.dot_dimension_numbers<[1], [0], [0], [1], [0, 0, 1, 1], [], []>} : vector<2x256xf32>, vector<256x256xf32>, vector<2x256xf32> -> vector<2x256xf32>
    %cst_57 = arith.constant 9.99999974E-6 : f32
    %103 = vector.broadcast %cst_57 : f32 to vector<2x256xf32>
    %104 = arith.addf %102, %103 : vector<2x256xf32>
    %105 = math.rsqrt %104 : vector<2x256xf32>
    %106 = vector.shape_cast %105 : vector<2x256xf32> to vector<2x1x256xf32>
    %107 = vector.shape_cast %91 : vector<1x256xf32> to vector<1x1x256xf32>
    %108 = vector.broadcast %107 : vector<1x1x256xf32> to vector<2x1x256xf32>
    %109 = arith.mulf %106, %108 : vector<2x1x256xf32>
    %110 = vector.broadcast %109 : vector<2x1x256xf32> to vector<2x8x256xf32>
    %111 = arith.mulf %99, %110 : vector<2x8x256xf32>
    %112 = vector.shape_cast %92 : vector<1x256xf32> to vector<1x1x256xf32>
    %113 = vector.broadcast %112 : vector<1x1x256xf32> to vector<2x8x256xf32>
    %114 = arith.addf %111, %113 : vector<2x8x256xf32>
    %115 = vector.shape_cast %114 : vector<2x8x256xf32> to vector<16x256xf32>
    %116 = vector.shape_cast %115 : vector<16x256xf32> to vector<2x8x256xf32>
    %c0_58 = arith.constant 0 : index
    %c0_59 = arith.constant 0 : index
    %c0_60 = arith.constant 0 : index
    %117 = vector.load %arg10[%c0_58, %c0_59, %c0_60] : memref<2x8x256xf32, #tpu.memory_space<vmem>>, vector<2x8x256xf32>
    tpu.vector_store %arg10[%c0_58, %c0_59, %c0_60], %116 {strides = array<i32>} : memref<2x8x256xf32, #tpu.memory_space<vmem>>, vector<2x8x256xf32>,
    return
  }
  func.func @transform_0(%arg0: i32) -> (i32, i32, i32) {
    %c0_i32 = arith.constant 0 : i32
    %c0_i32_0 = arith.constant 0 : i32
    %c0_i32_1 = arith.constant 0 : i32
    return %arg0, %c0_i32, %c0_i32_0 : i32, i32, i32
  }
  func.func @transform_1(%arg0: i32) -> (i32, i32) {
    %c0_i32 = arith.constant 0 : i32
    %c0_i32_0 = arith.constant 0 : i32
    %c0_i32_1 = arith.constant 0 : i32
    return %c0_i32, %c0_i32_0 : i32, i32
  }
  func.func @transform_2(%arg0: i32) -> (i32, i32, i32) {
    %c0_i32 = arith.constant 0 : i32
    %c0_i32_0 = arith.constant 0 : i32
    %c0_i32_1 = arith.constant 0 : i32
    %c0_i32_2 = arith.constant 0 : i32
    return %c0_i32, %c0_i32_0, %c0_i32_1 : i32, i32, i32
  }
  func.func @transform_3(%arg0: i32) -> (i32, i32) {
    %c0_i32 = arith.constant 0 : i32
    %c0_i32_0 = arith.constant 0 : i32
    %c0_i32_1 = arith.constant 0 : i32
    return %c0_i32, %c0_i32_0 : i32, i32
  }
  func.func @transform_4(%arg0: i32) -> (i32, i32) {
    %c0_i32 = arith.constant 0 : i32
    %c0_i32_0 = arith.constant 0 : i32
    %c0_i32_1 = arith.constant 0 : i32
    return %c0_i32, %c0_i32_0 : i32, i32
  }
  func.func @transform_5(%arg0: i32) -> (i32, i32) {
    %c0_i32 = arith.constant 0 : i32
    %c0_i32_0 = arith.constant 0 : i32
    %c0_i32_1 = arith.constant 0 : i32
    return %c0_i32, %c0_i32_0 : i32, i32
  }
  func.func @transform_6(%arg0: i32) -> (i32, i32) {
    %c0_i32 = arith.constant 0 : i32
    %c0_i32_0 = arith.constant 0 : i32
    %c0_i32_1 = arith.constant 0 : i32
    return %c0_i32, %c0_i32_0 : i32, i32
  }
  func.func @transform_7(%arg0: i32) -> (i32, i32) {
    %c0_i32 = arith.constant 0 : i32
    %c0_i32_0 = arith.constant 0 : i32
    %c0_i32_1 = arith.constant 0 : i32
    return %c0_i32, %c0_i32_0 : i32, i32
  }
  func.func @transform_8(%arg0: i32) -> (i32, i32) {
    %c0_i32 = arith.constant 0 : i32
    %c0_i32_0 = arith.constant 0 : i32
    %c0_i32_1 = arith.constant 0 : i32
    return %c0_i32, %c0_i32_0 : i32, i32
  }
  func.func @transform_9(%arg0: i32) -> (i32, i32, i32) {
    %c0_i32 = arith.constant 0 : i32
    %c0_i32_0 = arith.constant 0 : i32
    %c0_i32_1 = arith.constant 0 : i32
    return %arg0, %c0_i32, %c0_i32_0 : i32, i32, i32
  }
}

</mosaic_0001>

<bundles_post_ra>
// kernel: identity_block_forward.1
= control target key start
LH: loop header
LB: loop body
LE: loop exit
PB: predicated region body
PF: predicated region fallthrough
CT: control target
= control target key end

     0   :  { %14 = vsyncpa [#allocation3], 0  ;;  %s2929_s0 = inlined_call_operand.vmem [shape: f32[2,8,128], index: 0, kind: input, shape index: {}]   ;;  %s2930_s1 = inlined_call_operand.hbm [shape: bf16[128,128], index: 1, kind: input, shape index: {}]   ;;  %s2931_s2 = inlined_call_operand.hbm [shape: bf16[3,128,128], index: 2, kind: input, shape index: {}]   ;;  %s2932_s3 = inlined_call_operand.vmem [shape: bf16[128,256], index: 3, kind: input, shape index: {}]   ;;  %s2933_s4 = inlined_call_operand.vmem [shape: f32[6,128], index: 4, kind: input, shape index: {}]   ;;  %s2934_s5 = inlined_call_operand.vmem [shape: f32[3,256], index: 5, kind: input, shape index: {}]   ;;  %s2935_s6 = inlined_call_operand.hbm [shape: f32[128,128], index: 6, kind: input, shape index: {}]   ;;  %s2936_s7 = inlined_call_operand.hbm [shape: f32[256,256], index: 7, kind: input, shape index: {}]   ;;  %s2937_s8 = inlined_call_operand.vmem [shape: f32[16,2], index: 8, kind: input, shape index: {}]   ;;  %s2938_s9 = inlined_call_operand.vmem [shape: f32[2,8,256], index: 9, kind: output, shape index: {}]  }
   0x1   :  { %15 = vsyncpa [#allocation5], 0 }
   0x2   :  { %16 = vsyncpa [#allocation8], 0  ;;  %s2444_s30 = smov [#allocation4]   ;;  %s2445_s11 = smov [#allocation2]  }
   0x3   :  { %s36_s10 = sshll.u32 %s2444_s30, 4  ;;  %s24_s12 = sshll.u32 %s2445_s11, 4  ;;  %s37_s10 = int_to_ptr.vmem [resolvable:$true] %s36_s10  ;;  %s2510_s12 = int_to_ptr.vmem [resolvable:$true] %s24_s12 }
   0x4   :  { %s2350_s15 = scalar_lea.hbm %s2931_s2, 3072 }
   0x5   :  { %p2351_p0 = scmp.ne.s32.totalorder %s2931_s2, %s2350_s15  ;;  %p2354_p1 = scmp.lt.u32.totalorder %s2350_s15, %s2931_s2 }
   0x7   :  { %p2356_p2 = pnand %p2354_p1, %p2351_p0 }
   0x9   :  { %2359 = shalt.err (!%p2356_p2)
}
   0xa   :  { %s2360_s20 = scalar_lea.vmem %s37_s10, 3072  ;;  %p2365_p4 = scmp.lt.s32.totalorder %s37_s10, %s37_s10 }
   0xb   :  { %p2361_p3 = scmp.ne.s32.totalorder %s37_s10, %s2360_s20  ;;  %p2366_p5 = scmp.lt.s32.totalorder %s2360_s20, %s2360_s20 }
   0xd   :  { %p2367_p6 = por %p2366_p5, %p2365_p4 }
   0xf   :  { %p2368_p7 = pnand %p2367_p6, %p2361_p3 }
  0x11   :  { %2371 = shalt.err (!%p2368_p7)
}
  0x12   :  { %s2446_s21 = smov 64   ;;  %s2447_s22 = smov 4  }
  0x13   :  { %42 = dma.hbm_to_vmem [thread:$0]  %s2931_s2, 3072, %s37_s10, [#allocation5], %s2446_s21, %s2446_s21, %s2447_s22  }
  0x14   :  { %s2372_s27 = scalar_lea.hbm %s2930_s1, 1024 }
  0x15   :  { %p2373_p8 = scmp.ne.s32.totalorder %s2930_s1, %s2372_s27  ;;  %p2376_p9 = scmp.lt.u32.totalorder %s2372_s27, %s2930_s1 }
  0x17   :  { %p2378_p10 = pnand %p2376_p9, %p2373_p8 }
  0x19   :  { %2381 = shalt.err (!%p2378_p10)
}
  0x1a   :  { %s2382_s13 = scalar_lea.vmem %s2510_s12, 1024  ;;  %p2387_p12 = scmp.lt.s32.totalorder %s2510_s12, %s2510_s12 }
  0x1b   :  { %p2383_p11 = scmp.ne.s32.totalorder %s2510_s12, %s2382_s13  ;;  %p2388_p13 = scmp.lt.s32.totalorder %s2382_s13, %s2382_s13 }
  0x1d   :  { %p2389_p0 = por %p2388_p13, %p2387_p12 }
  0x1f   :  { %p2390_p1 = pnand %p2389_p0, %p2383_p11 }
  0x21   :  { %2393 = shalt.err (!%p2390_p1)
}
  0x22   :  { %30 = dma.hbm_to_vmem [thread:$0]  %s2930_s1, 1024, %s2510_s12, [#allocation3], %s2446_s21, %s2446_s21, %s2447_s22  }
  0x23   :  { %s2448_s14 = smov [#allocation6]   ;;  %s2394_s18 = scalar_lea.hbm %s2935_s6, 2048 }
  0x24   :  { %s54_s15 = sshll.u32 %s2448_s14, 4  ;;  %p2395_p2 = scmp.ne.s32.totalorder %s2935_s6, %s2394_s18  ;;  %s55_s15 = int_to_ptr.vmem [resolvable:$true] %s54_s15 }
  0x25   :  { %p2398_p3 = scmp.lt.u32.totalorder %s2394_s18, %s2935_s6 }
  0x27   :  { %p2400_p4 = pnand %p2398_p3, %p2395_p2 }
  0x29   :  { %2403 = shalt.err (!%p2400_p4)
}
  0x2a   :  { %s2404_s25 = scalar_lea.vmem %s55_s15, 2048  ;;  %p2409_p6 = scmp.lt.s32.totalorder %s55_s15, %s55_s15 }
  0x2b   :  { %p2405_p5 = scmp.ne.s32.totalorder %s55_s15, %s2404_s25  ;;  %p2410_p7 = scmp.lt.s32.totalorder %s2404_s25, %s2404_s25 }
  0x2d   :  { %p2411_p8 = por %p2410_p7, %p2409_p6 }
  0x2f   :  { %p2412_p9 = pnand %p2411_p8, %p2405_p5 }
  0x31   :  { %2415 = shalt.err (!%p2412_p9)
}
  0x32   :  { %s2449_s1 = smov 128   ;;  %s2450_s12 = smov 8  }
  0x33   :  { %60 = dma.hbm_to_vmem [thread:$0]  %s2935_s6, 2048, %s55_s15, [#allocation5], %s2449_s1, %s2449_s1, %s2450_s12  }
  0x34   :  { %s2451_s26 = smov [#allocation7]   ;;  %s2416_s30 = scalar_lea.hbm %s2936_s7, 8192 }
  0x35   :  { %s66_s27 = sshll.u32 %s2451_s26, 4  ;;  %p2417_p10 = scmp.ne.s32.totalorder %s2936_s7, %s2416_s30  ;;  %s67_s27 = int_to_ptr.vmem [resolvable:$true] %s66_s27 }
  0x36   :  { %p2420_p11 = scmp.lt.u32.totalorder %s2416_s30, %s2936_s7 }
  0x38   :  { %p2422_p12 = pnand %p2420_p11, %p2417_p10 }
  0x3a   :  { %2425 = shalt.err (!%p2422_p12)
}
  0x3b   :  { %s2426_s14 = scalar_lea.vmem %s67_s27, 8192  ;;  %p2431_p0 = scmp.lt.s32.totalorder %s67_s27, %s67_s27 }
  0x3c   :  { %p2427_p13 = scmp.ne.s32.totalorder %s67_s27, %s2426_s14  ;;  %p2432_p1 = scmp.lt.s32.totalorder %s2426_s14, %s2426_s14 }
  0x3e   :  { %p2433_p2 = por %p2432_p1, %p2431_p0 }
  0x40   :  { %p2434_p3 = pnand %p2433_p2, %p2427_p13 }
  0x42   :  { %2437 = shalt.err (!%p2434_p3)
}
  0x43   :  { %s2452_s6 = smov 256   ;;  %s2453_s15 = smov 16  }
  0x44   :  { %72 = dma.hbm_to_vmem [thread:$0]  %s2936_s7, 8192, %s67_s27, [#allocation8], %s2452_s6, %s2452_s6, %s2453_s15  }
  0x45   :  { %2438 = dma.done.wait [#allocation3], 1024  }
  0x46   :  { %2439 = vsyncadd [#allocation3], 4294966272 }
  0x47   :  { %2440 = dma.done.wait [#allocation5], 5120  }
  0x48   :  { %2441 = vsyncadd [#allocation5], 4294962176 }
  0x49   :  { %2442 = dma.done.wait [#allocation8], 8192  }
  0x4a   :  { %2443 = vsyncadd [#allocation8], 4294959104  ;;  %v2454_v0 = vmov 0.0   ;;  %vm2455_vm0 = vmmov 0   ;;  %v2456_v1 = vmov 0.0|0.0   ;;  %v2286_v2 = vld [vmem:[#allocation2] sm:$0xff]   ;;  %v310_v63 = vlaneseq }
  0x4b   :  { %1823 = vmatprep.subr.bf16.mxu0 %v2454_v0  ;;  %1839 = vmatprep.mubr.msk.bf16.mxu0 %vm2455_vm0, %v2454_v0  ;;  %v2287_v3 = vld [vmem:[#allocation2 + $0x8] sm:$0xff]   ;;  %v2288_v4 = vld [vmem:[#allocation2 + $0x10] sm:$0xff]   ;;  %v203_v5 = vld [vmem:[#allocation6] sm:$0xff]  ;;  %vm233_vm1 = vcmask 1041409   ;;  %v2457_v58 = vmov 1   ;;  %v2458_v59 = vmov 0  }
  0x4c   :  { %2043 = vmatprep.subr.bf16.mxu1 %v2456_v1  ;;  %1875 = vmatprep.mubr.msk.f32.mxu1 %vm2455_vm0, %v2454_v0  ;;  %v204_v6 = vld [vmem:[#allocation6 + $0x8] sm:$0xff]  ;;  %v205_v7 = vld [vmem:[#allocation6 + $0x10] sm:$0xff]  ;;  %v206_v8 = vld [vmem:[#allocation6 + $0x18] sm:$0xff]  ;;  %v2459_v61 = vmov 1966171168  }
  0x4d   :  { %1824 = vmatpush3.bf16.msra.mxu0 %v2286_v2  ;;  %v2289_v9 = vld [vmem:[#allocation2 + $0x18] sm:$0xff]   ;;  %v2573_v10 = vpack.c.bf16 %v204_v6, %v203_v5  ;;  %v207_v11 = vld [vmem:[#allocation6 + $0x20] sm:$0xff]  ;;  %v208_v12 = vld [vmem:[#allocation6 + $0x28] sm:$0xff]  ;;  %v2577_v14 = vpack.c.bf16 %v206_v8, %v205_v7  ;;  %2284 = vset.pattern.permute.xlu1 %v2457_v58  ;;  %v308_v62 = vunpack.c.l.s4 %v2459_v61 }
  0x4e   :  { %1825 = vmatprep.subr.bf16.mxu0 %v2454_v0  ;;  %v2290_v13 = vld [vmem:[#allocation2 + $0x20] sm:$0xff]   ;;  %v209_v15 = vld [vmem:[#allocation6 + $0x30] sm:$0xff]  ;;  %v210_v16 = vld [vmem:[#allocation6 + $0x38] sm:$0xff]  ;;  %v2582_v18 = vpack.c.bf16 %v208_v12, %v207_v11  ;;  %2283 = vset.pattern.permute.xlu0 %v2458_v59 }
  0x4f   :  { %2045 = vmatpush3.bf16.msra.mxu1 %v2573_v10  ;;  %v2291_v17 = vld [vmem:[#allocation2 + $0x28] sm:$0xff]   ;;  %v2292_v19 = vld [vmem:[#allocation2 + $0x30] sm:$0xff]   ;;  %v2587_v20 = vpack.c.bf16 %v210_v16, %v209_v15  ;;  %v2293_v21 = vld [vmem:[#allocation2 + $0x38] sm:$0xff]   ;;  %v309_v2 = vunpack.c.0.s8 %v308_v62 }
  0x50   :  { %2046 = vmatprep.subr.bf16.mxu1 %v2456_v1  ;;  %v88_v22 = vld [vmem:[%s2929_s0] sm:$0xff]  ;;  %v89_v23 = vld [vmem:[%s2929_s0 + $0x8] sm:$0xff]  ;;  %v213_v28 = vld [vmem:[#allocation6 + $0x50] sm:$0xff] }
  0x51   :  { %1826 = vmatpush3.bf16.msra.mxu0 %v2287_v3  ;;  %v90_v24 = vpack.c.bf16 %v89_v23, %v88_v22  ;;  %v211_v25 = vld [vmem:[#allocation6 + $0x40] sm:$0xff]  ;;  %v212_v26 = vld [vmem:[#allocation6 + $0x48] sm:$0xff]  ;;  %v214_v29 = vld [vmem:[#allocation6 + $0x58] sm:$0xff]  ;;  %v2648_v3 = vshrl.u32 %v310_v63, 7 }
  0x52   :  { %1827 = vmatprep.subr.bf16.mxu0 %v2454_v0  ;;  %v2611_v27 = vpack.c.bf16 %v212_v26, %v211_v25  ;;  %v2617_v30 = vpack.c.bf16 %v214_v29, %v213_v28  ;;  %v215_v31 = vld [vmem:[#allocation6 + $0x60] sm:$0xff]  ;;  %v216_v32 = vld [vmem:[#allocation6 + $0x68] sm:$0xff]  ;;  %v217_v34 = vld [vmem:[#allocation6 + $0x70] sm:$0xff] }
  0x53   :  { %2048 = vmatpush3.bf16.msra.mxu1 %v2577_v14  ;;  %v2623_v33 = vpack.c.bf16 %v216_v32, %v215_v31  ;;  %v218_v35 = vld [vmem:[#allocation6 + $0x78] sm:$0xff]  ;;  %v1665_v37 = vld [vmem:[%s2933_s4] ss:$0 sm:$0xff]  ;;  %v480_v60 = vld [vmem:[%s2937_s8 + $0x8] sm:$0xff]  ;;  %v2655_v7 = vsub.s32 0, %v2648_v3  ;;  %vm485_vm2 = vcmp.lt.s32.totalorder %v2648_v3, 1 }
  0x54   :  { %2049 = vmatprep.subr.bf16.mxu1 %v2456_v1  ;;  %v2628_v36 = vpack.c.bf16 %v218_v35, %v217_v34  ;;  %v479_v57 = vld [vmem:[%s2937_s8] sm:$0xff]  ;;  %vm503_vm3 = vcmp.lt.s32.totalorder %v2648_v3, 7 }
  0x55   :  { %1828 = vmatpush3.bf16.msra.mxu0 %v2288_v4  ;;  %507 = vperm.xlu1 %2284, %v479_v57   ;;  %v2651_v4 = vsub.s32 %v309_v2, %v2648_v3  ;;  %v201_v61 = vld [vmem:[%s2933_s4 + $0x1] sm:$0x1] }
  0x56   :  { %1829 = vmatprep.subr.bf16.mxu0 %v2454_v0  ;;  %490 = vperm.xlu0 %2283, %v479_v57  }
  0x57   :  { %2051 = vmatpush3.bf16.msra.mxu1 %v2582_v18 }
  0x58   :  { %2052 = vmatprep.subr.bf16.mxu1 %v2456_v1 }
  0x59   :  { %1830 = vmatpush3.bf16.msra.mxu0 %v2289_v9  ;;  %511 = vperm.xlu1 %2284, %v480_v60  }
  0x5a   :  { %1831 = vmatprep.subr.bf16.mxu0 %v2454_v0  ;;  %495 = vperm.xlu0 %2283, %v480_v60  }
  0x5b   :  { %2054 = vmatpush3.bf16.msra.mxu1 %v2587_v20 }
  0x5c   :  { %2055 = vmatprep.subr.bf16.mxu1 %v2456_v1 }
  0x5d   :  { %1832 = vmatpush3.bf16.msra.mxu0 %v2290_v13 }
  0x5e   :  { %1833 = vmatprep.subr.bf16.mxu0 %v2454_v0  ;;  %2285 = vset.pattern.permute.xlu0 %v2457_v58 }
  0x5f   :  { %2057 = vmatpush3.bf16.msra.mxu1 %v2611_v27 }
  0x60   :  { %2058 = vmatprep.subr.bf16.mxu1 %v2456_v1 }
  0x61   :  { %1834 = vmatpush3.bf16.msra.mxu0 %v2291_v17 }
  0x62   :  { %1835 = vmatprep.subr.bf16.mxu0 %v2454_v0 }
  0x63   :  { %2060 = vmatpush3.bf16.msra.mxu1 %v2617_v30 }
  0x64   :  { %2061 = vmatprep.subr.bf16.mxu1 %v2456_v1 }
  0x65   :  { %1836 = vmatpush3.bf16.msra.mxu0 %v2292_v19 }
  0x66   :  { %1837 = vmatprep.subr.bf16.mxu0 %v2454_v0 }
  0x67   :  { %2063 = vmatpush3.bf16.msra.mxu1 %v2623_v33 }
  0x68   :  { %2064 = vmatprep.subr.bf16.mxu1 %v2456_v1 }
  0x69   :  { %1838 = vmatpush3.bf16.msra.mxu0 %v2293_v21 }
  0x6a   :  { %2067 = vmatprep.subr.bf16.mxu0 %v2456_v1 }
  0x6b   :  { %2066 = vmatpush3.bf16.msra.mxu1 %v2628_v36 }
  0x6c   :  { %1840 = vmatmul.mubr.bf16.vlgmr.msra.gmra.mrb[0].mxu0 %v90_v24  ;;  %1913 = vmatprep.subr.bf16.mxu1 %v2454_v0 }
  0x6d   :  { %2069 = vmatpush3.bf16.msra.mxu0 %v2573_v10  ;;  %1910 = vmatprep.mubr.msk.f32.mxu0 %vm2455_vm0, %v2454_v0 }
  0x6e   :  { %2070 = vmatprep.subr.bf16.mxu0 %v2456_v1 }
  0x71   :  { %2072 = vmatpush3.bf16.msra.mxu0 %v2577_v14 }
  0x72   :  { %2073 = vmatprep.subr.bf16.mxu0 %v2456_v1 }
  0x75   :  { %2075 = vmatpush3.bf16.msra.mxu0 %v2582_v18 }
  0x76   :  { %2076 = vmatprep.subr.bf16.mxu0 %v2456_v1 }
  0x79   :  { %2078 = vmatpush3.bf16.msra.mxu0 %v2587_v20 }
  0x7a   :  { %2079 = vmatprep.subr.bf16.mxu0 %v2456_v1 }
  0x7d   :  { %2081 = vmatpush3.bf16.msra.mxu0 %v2611_v27 }
  0x7e   :  { %2082 = vmatprep.subr.bf16.mxu0 %v2456_v1 }
  0x81   :  { %2084 = vmatpush3.bf16.msra.mxu0 %v2617_v30 }
  0x82   :  { %2085 = vmatprep.subr.bf16.mxu0 %v2456_v1 }
  0x85   :  { %2087 = vmatpush3.bf16.msra.mxu0 %v2623_v33 }
  0x86   :  { %2088 = vmatprep.subr.bf16.mxu0 %v2456_v1 }
  0x89   :  { %2090 = vmatpush3.bf16.msra.mxu0 %v2628_v36 }
  0x8a   :  { %1933 = vmatprep.subr.bf16.mxu0 %v2454_v0 }
 0x13f   :  { %v194_v38 = vpop.f32.mrb[0].mxu0 }
 0x140   :  { %v195_v39 = vadd.f32 %v1665_v37, %v194_v38  ;;  %v1841_v40 = vpop.f32.mrb[1].mxu0 }
 0x141   :  { %v197_v41 = vpop.f32.mrb[2].mxu0  ;;  %v2295_v40 = vld [vmem:[#allocation4 + $0x48] sm:$0xff]  }
 0x142   :  { %v219_v42 = vrot.slane %v195_v39, 4  ;;  %v198_v43 = vadd.f32 %v1665_v37, %v197_v41  ;;  %v1842_v44 = vpop.f32.mrb[3].mxu0  ;;  %v2296_v41 = vld [vmem:[#allocation4] sm:$0xff]  }
 0x143   :  { %v2299_v44 = vld [vmem:[#allocation4 + $0x58] sm:$0xff]  }
 0x144   :  { %v220_v45 = vadd.f32 %v219_v42, %v195_v39  ;;  %v225_v46 = vrot.slane %v198_v43, 4  ;;  %v2297_v42 = vld [vmem:[#allocation4 + $0x50] sm:$0xff]  }
 0x146   :  { %v221_v47 = vrot.slane %v220_v45, 2  ;;  %v226_v48 = vadd.f32 %v225_v46, %v198_v43  ;;  %v2301_v46 = vld [vmem:[#allocation4 + $0x60] sm:$0xff]  }
 0x148   :  { %v222_v49 = vadd.f32 %v221_v47, %v220_v45  ;;  %v227_v50 = vrot.slane %v226_v48, 2  ;;  %v2300_v45 = vld [vmem:[#allocation4 + $0x10] sm:$0xff]   ;;  %v2302_v47 = vld [vmem:[#allocation4 + $0x18] sm:$0xff]  }
 0x14a   :  { %v228_v51 = vadd.f32 %v227_v50, %v226_v48  ;;  %v223_v52 = vrot.slane %v222_v49, 1  ;;  %v2303_v48 = vld [vmem:[#allocation4 + $0x68] sm:$0xff]   ;;  %v2305_v50 = vld [vmem:[#allocation4 + $0x70] sm:$0xff]  }
 0x14c   :  { %v229_v53 = vrot.slane %v228_v51, 1  ;;  %v224_v54 = vadd.f32 %v223_v52, %v222_v49  ;;  %v2304_v49 = vld [vmem:[#allocation4 + $0x20] sm:$0xff]   ;;  %v2307_v52 = vld [vmem:[#allocation4 + $0x78] sm:$0xff]  }
 0x14e   :  { %v230_v55 = vadd.f32 %v229_v53, %v228_v51  ;;  %v2306_v51 = vld [vmem:[#allocation4 + $0x28] sm:$0xff]   ;;  %v2308_v53 = vld [vmem:[#allocation4 + $0x30] sm:$0xff]  }
 0x150   :  { %v234_v56 = vsel %vm233_vm1, %v230_v55, %v224_v54  ;;  %v2310_v54 = vld [vmem:[#allocation4 + $0x38] sm:$0xff]  }
 0x151   :  { %1876 = vmatmul.mubr.f32.vlgmr.msra.gmra.mrb[0].mxu1 %v234_v56 }
 0x152   :  { %1929 = vmatprep.mubr.msk.bf16.mxu1 %vm2455_vm0, %v2454_v0 }
 0x224   :  { %v302_v5 = vpop.f32.mrb[0].mxu1 }
 0x225   :  { %v313_v6 = vrot.slane %v302_v5, %v2651_v4  ;;  %v1877_v8 = vpop.f32.mrb[1].mxu1 }
 0x227   :  { %v314_v9 = vcombine.high %v313_v6, %v313_v6  ;;  %v321_v11 = vrot.slane %v313_v6, %v2651_v4 }
 0x229   :  { %v328_v12 = vrot.slane %v314_v9, %v2651_v4  ;;  %v332_v13 = vrot.slane %v321_v11, %v2655_v7  ;;  %v1674_v9 = vld [vmem:[%s2933_s4 + $0x2] ss:$0 sm:$0xff] }
 0x22b   :  { %v336_v15 = vrot.slane %v328_v12, %v2655_v7  ;;  %v2661_v16 = vsub.f32 %v195_v39, %v332_v13  ;;  %v2294_v39 = vld [vmem:[#allocation4 + $0x40] sm:$0xff]  }
 0x22c   :  { %1914 = vmatpush3.bf16.msra.mxu1 %v2294_v39  ;;  %v2314_v39 = vld [vmem:[#allocation4 + $0xa0] sm:$0xff]  }
 0x22d   :  { %v2663_v17 = vsub.f32 %v198_v43, %v336_v15  ;;  %v341_v19 = vmul.f32 %v2661_v16, %v2661_v16  ;;  %1915 = vmatprep.subr.bf16.mxu1 %v2454_v0  ;;  %v2298_v43 = vld [vmem:[#allocation4 + $0x8] sm:$0xff]  }
 0x22f   :  { %v342_v21 = vmul.f32 %v2663_v17, %v2663_v17  ;;  %v343_v22 = vrot.slane %v341_v19, 4 }
 0x230   :  { %1916 = vmatpush3.bf16.msra.mxu1 %v2295_v40  ;;  %v508_v40 = vpop.permute.xlu1 %507 }
 0x231   :  { %v344_v23 = vadd.f32 %v343_v22, %v341_v19  ;;  %v349_v24 = vrot.slane %v342_v21, 4  ;;  %1917 = vmatprep.subr.bf16.mxu1 %v2454_v0  ;;  %v491_v19 = vpop.permute.xlu0 %490 }
 0x233   :  { %v345_v25 = vrot.slane %v344_v23, 2  ;;  %v350_v26 = vadd.f32 %v349_v24, %v342_v21  ;;  %v2309_v24 = vld [vmem:[#allocation4 + $0x80] sm:$0xff]  }
 0x234   :  { %1918 = vmatpush3.bf16.msra.mxu1 %v2297_v42 }
 0x235   :  { %v346_v28 = vadd.f32 %v345_v25, %v344_v23  ;;  %v351_v29 = vrot.slane %v350_v26, 2  ;;  %1919 = vmatprep.subr.bf16.mxu1 %v2454_v0 }
 0x237   :  { %v347_v31 = vrot.slane %v346_v28, 1  ;;  %v352_v32 = vadd.f32 %v351_v29, %v350_v26 }
 0x238   :  { %1920 = vmatpush3.bf16.msra.mxu1 %v2299_v44  ;;  %v2316_v44 = vld [vmem:[#allocation4 + $0xb0] sm:$0xff]  }
 0x239   :  { %v353_v34 = vrot.slane %v352_v32, 1  ;;  %v348_v35 = vadd.f32 %v347_v31, %v346_v28  ;;  %1921 = vmatprep.subr.bf16.mxu1 %v2454_v0  ;;  %v496_v28 = vpop.permute.xlu0 %495 }
 0x23b   :  { %v354_v37 = vadd.f32 %v353_v34, %v352_v32 }
 0x23c   :  { %1922 = vmatpush3.bf16.msra.mxu1 %v2301_v46  ;;  %v512_v46 = vpop.permute.xlu1 %511 }
 0x23d   :  { %v357_v38 = vsel %vm233_vm1, %v354_v37, %v348_v35  ;;  %1923 = vmatprep.subr.bf16.mxu1 %v2454_v0  ;;  %v2312_v37 = vld [vmem:[#allocation4 + $0x90] sm:$0xff]  }
 0x23e   :  { %1911 = vmatmul.mubr.f32.vlgmr.msra.gmra.mrb[4].mxu0 %v357_v38  ;;  %v2313_v38 = vld [vmem:[#allocation4 + $0x98] sm:$0xff]  }
 0x23f   :  { %1949 = vmatprep.mubr.msk.bf16.mxu0 %vm2455_vm0, %v2454_v0  ;;  %1934 = vmatpush3.bf16.msra.mxu0 %v2296_v41  ;;  %v2315_v41 = vld [vmem:[#allocation4 + $0xa8] sm:$0xff]  }
 0x240   :  { %1935 = vmatprep.subr.bf16.mxu0 %v2454_v0  ;;  %1924 = vmatpush3.bf16.msra.mxu1 %v2303_v48  ;;  %v2317_v48 = vld [vmem:[#allocation4 + $0xb8] sm:$0xff]  }
 0x241   :  { %1925 = vmatprep.subr.bf16.mxu1 %v2454_v0 }
 0x243   :  { %1936 = vmatpush3.bf16.msra.mxu0 %v2298_v43 }
 0x244   :  { %1937 = vmatprep.subr.bf16.mxu0 %v2454_v0  ;;  %1926 = vmatpush3.bf16.msra.mxu1 %v2305_v50 }
 0x245   :  { %1927 = vmatprep.subr.bf16.mxu1 %v2454_v0 }
 0x247   :  { %1938 = vmatpush3.bf16.msra.mxu0 %v2300_v45 }
 0x248   :  { %1939 = vmatprep.subr.bf16.mxu0 %v2454_v0  ;;  %1928 = vmatpush3.bf16.msra.mxu1 %v2307_v52 }
 0x249   :  { %1953 = vmatprep.subr.bf16.mxu1 %v2454_v0 }
 0x24b   :  { %1940 = vmatpush3.bf16.msra.mxu0 %v2302_v47 }
 0x24c   :  { %1941 = vmatprep.subr.bf16.mxu0 %v2454_v0 }
 0x24f   :  { %1942 = vmatpush3.bf16.msra.mxu0 %v2304_v49 }
 0x250   :  { %1943 = vmatprep.subr.bf16.mxu0 %v2454_v0 }
 0x253   :  { %1944 = vmatpush3.bf16.msra.mxu0 %v2306_v51 }
 0x254   :  { %1945 = vmatprep.subr.bf16.mxu0 %v2454_v0 }
 0x257   :  { %1946 = vmatpush3.bf16.msra.mxu0 %v2308_v53 }
 0x258   :  { %1947 = vmatprep.subr.bf16.mxu0 %v2454_v0 }
 0x25b   :  { %1948 = vmatpush3.bf16.msra.mxu0 %v2310_v54 }
 0x25c   :  { %2091 = vmatprep.subr.bf16.mxu0 %v2456_v1 }
 0x311   :  { %v425_v55 = vpop.f32.mrb[4].mxu0 }
 0x312   :  { %v426_v56 = vadd.f32 1e-05, %v425_v55  ;;  %v1912_v57 = vpop.f32.mrb[5].mxu0 }
 0x314   :  { %2342 = vrsqrt.f32 %v426_v56 }
 0x31e   :  { %v2343_v58 = vpop.eup %2342 }
 0x31f   :  { %v437_v60 = vrot.slane %v2343_v58, %v2651_v4 }
 0x321   :  { %v438_v62 = vcombine.high %v437_v60, %v437_v60  ;;  %v445_v63 = vrot.slane %v437_v60, %v2651_v4 }
 0x323   :  { %v452_v2 = vrot.slane %v438_v62, %v2651_v4  ;;  %v455_v5 = vmul.f32 %v445_v63, %v201_v61 }
 0x325   :  { %v456_v6 = vmul.f32 %v452_v2, %v201_v61  ;;  %v462_v8 = vrot.slane %v455_v5, %v2655_v7 }
 0x327   :  { %v466_v11 = vrot.slane %v456_v6, %v2655_v7  ;;  %v469_v12 = vmul.f32 %v462_v8, %v2661_v16  ;;  %v2311_v16 = vld [vmem:[#allocation4 + $0x88] sm:$0xff]  }
 0x329   :  { %v470_v13 = vmul.f32 %v466_v11, %v2663_v17  ;;  %v475_v15 = vadd.f32 %v1674_v9, %v469_v12 }
 0x32b   :  { %v476_v21 = vadd.f32 %v1674_v9, %v470_v13  ;;  %v477_v22 = vmax.f32 %v475_v15, 0.0 }
 0x32d   :  { %v478_v23 = vmax.f32 %v476_v21, 0.0  ;;  %v481_v25 = vrot.slane %v477_v22, 7  ;;  %v501_v43 = vrot.slane %v477_v22, 1 }
 0x32f   :  { %v482_v26 = vrot.slane %v478_v23, 7  ;;  %v517_v29 = vpack.c.bf16 %v478_v23, %v477_v22  ;;  %v502_v42 = vrot.slane %v478_v23, 1  ;;  %v2318_v22 = vld [vmem:[%s2932_s3] ss:$8 sps:$4 sm:$0xff]   ;;  %v2320_v23 = vld [vmem:[%s2932_s3 + $0x4] ss:$8 sps:$4 sm:$0xff]  }
 0x331   :  { %v487_v31 = vsel %vm485_vm2, %v482_v26, %v481_v25  ;;  %v486_v32 = vsel %vm485_vm2, %v481_v25, %v482_v26  ;;  %1930 = vmatmul.mubr.bf16.vlgmr.msra.gmra.mrb[4].mxu1 %v517_v29  ;;  %v504_v45 = vsel %vm503_vm3, %v501_v43, %v502_v42  ;;  %v505_v47 = vsel %vm503_vm3, %v502_v42, %v501_v43 }
 0x332   :  { %v498_v34 = vmul.f32 %v491_v19, %v487_v31  ;;  %v499_v35 = vmul.f32 %v496_v28, %v486_v32  ;;  %1954 = vmatpush3.bf16.msra.mxu1 %v2309_v24  ;;  %1969 = vmatprep.mubr.msk.bf16.mxu1 %vm2455_vm0, %v2454_v0  ;;  %v514_v49 = vmul.f32 %v508_v40, %v504_v45 }
 0x333   :  { %1955 = vmatprep.subr.bf16.mxu1 %v2454_v0  ;;  %v515_v50 = vmul.f32 %v512_v46, %v505_v47 }
 0x334   :  { %v500_v17 = vpack.c.bf16 %v499_v35, %v498_v34 }
 0x335   :  { %v516_v51 = vpack.c.bf16 %v515_v50, %v514_v49  ;;  %v2323_v50 = vld [vmem:[%s2932_s3 + $0x14] ss:$8 sps:$4 sm:$0xff]  }
 0x336   :  { %1956 = vmatpush3.bf16.msra.mxu1 %v2311_v16  ;;  %1950 = vmatmul.mubr.bf16.vlgmr.msra.gmra.mrb[8].mxu0 %v500_v17 }
 0x337   :  { %1957 = vmatprep.subr.bf16.mxu1 %v2454_v0  ;;  %2093 = vmatpush3.bf16.msra.mxu0 %v2573_v10 }
 0x338   :  { %2094 = vmatprep.subr.bf16.mxu0 %v2456_v1  ;;  %2005 = vmatprep.mubr.msk.f32.mxu0 %vm2455_vm0, %v2454_v0 }
 0x33a   :  { %1958 = vmatpush3.bf16.msra.mxu1 %v2312_v37 }
 0x33b   :  { %1959 = vmatprep.subr.bf16.mxu1 %v2454_v0  ;;  %2096 = vmatpush3.bf16.msra.mxu0 %v2577_v14 }
 0x33c   :  { %2097 = vmatprep.subr.bf16.mxu0 %v2456_v1 }
 0x33e   :  { %1960 = vmatpush3.bf16.msra.mxu1 %v2313_v38 }
 0x33f   :  { %1961 = vmatprep.subr.bf16.mxu1 %v2454_v0  ;;  %2099 = vmatpush3.bf16.msra.mxu0 %v2582_v18 }
 0x340   :  { %2100 = vmatprep.subr.bf16.mxu0 %v2456_v1 }
 0x342   :  { %1962 = vmatpush3.bf16.msra.mxu1 %v2314_v39 }
 0x343   :  { %1963 = vmatprep.subr.bf16.mxu1 %v2454_v0  ;;  %2102 = vmatpush3.bf16.msra.mxu0 %v2587_v20 }
 0x344   :  { %2103 = vmatprep.subr.bf16.mxu0 %v2456_v1 }
 0x346   :  { %1964 = vmatpush3.bf16.msra.mxu1 %v2315_v41 }
 0x347   :  { %1965 = vmatprep.subr.bf16.mxu1 %v2454_v0  ;;  %2105 = vmatpush3.bf16.msra.mxu0 %v2611_v27 }
 0x348   :  { %2106 = vmatprep.subr.bf16.mxu0 %v2456_v1 }
 0x34a   :  { %1966 = vmatpush3.bf16.msra.mxu1 %v2316_v44 }
 0x34b   :  { %1967 = vmatprep.subr.bf16.mxu1 %v2454_v0  ;;  %2108 = vmatpush3.bf16.msra.mxu0 %v2617_v30 }
 0x34c   :  { %2109 = vmatprep.subr.bf16.mxu0 %v2456_v1 }
 0x34e   :  { %1968 = vmatpush3.bf16.msra.mxu1 %v2317_v48 }
 0x34f   :  { %2111 = vmatpush3.bf16.msra.mxu0 %v2623_v33  ;;  %2115 = vmatprep.subr.bf16.mxu1 %v2456_v1 }
 0x350   :  { %2112 = vmatprep.subr.bf16.mxu0 %v2456_v1 }
 0x351   :  { %1970 = vmatmul.mubr.bf16.vlgmr.msra.gmra.mrb[8].mxu1 %v516_v51  ;;  %v2321_v51 = vld [vmem:[%s2932_s3 + $0x10] ss:$8 sps:$4 sm:$0xff]  }
 0x352   :  { %2117 = vmatpush3.bf16.msra.mxu1 %v2573_v10  ;;  %2040 = vmatprep.mubr.msk.f32.mxu1 %vm2455_vm0, %v2454_v0 }
 0x353   :  { %2114 = vmatpush3.bf16.msra.mxu0 %v2628_v36  ;;  %2118 = vmatprep.subr.bf16.mxu1 %v2456_v1 }
 0x354   :  { %1212 = vmatprep.subr.bf16.mxu0 %v2320_v23  ;;  %v1271_v23 = vld [vmem:[#allocation7 + $0x60] sm:$0xff] }
 0x356   :  { %2120 = vmatpush3.bf16.msra.mxu1 %v2577_v14 }
 0x357   :  { %2121 = vmatprep.subr.bf16.mxu1 %v2456_v1 }
 0x35a   :  { %2123 = vmatpush3.bf16.msra.mxu1 %v2582_v18 }
 0x35b   :  { %2124 = vmatprep.subr.bf16.mxu1 %v2456_v1 }
 0x35e   :  { %2126 = vmatpush3.bf16.msra.mxu1 %v2587_v20 }
 0x35f   :  { %2127 = vmatprep.subr.bf16.mxu1 %v2456_v1 }
 0x362   :  { %2129 = vmatpush3.bf16.msra.mxu1 %v2611_v27 }
 0x363   :  { %2130 = vmatprep.subr.bf16.mxu1 %v2456_v1 }
 0x366   :  { %2132 = vmatpush3.bf16.msra.mxu1 %v2617_v30  ;;  %v1699_v30 = vld [vmem:[%s2933_s4 + $0x3] ss:$0 sm:$0xff] }
 0x367   :  { %2133 = vmatprep.subr.bf16.mxu1 %v2456_v1 }
 0x36a   :  { %2135 = vmatpush3.bf16.msra.mxu1 %v2623_v33 }
 0x36b   :  { %2136 = vmatprep.subr.bf16.mxu1 %v2456_v1 }
 0x36e   :  { %2138 = vmatpush3.bf16.msra.mxu1 %v2628_v36 }
 0x404   :  { %v633_v0 = vpop.f32.mrb[4].mxu1 }
 0x405   :  { %v1931_v10 = vpop.f32.mrb[5].mxu1 }
 0x406   :  { %v636_v14 = vpop.f32.mrb[6].mxu1  ;;  %v2324_v10 = vld [vmem:[%s2932_s3 + $0x20] ss:$8 sps:$4 sm:$0xff]  }
 0x407   :  { %v1932_v18 = vpop.f32.mrb[7].mxu1 }
 0x408   :  { %v2327_v18 = vld [vmem:[%s2932_s3 + $0x30] ss:$8 sps:$4 sm:$0xff]  }
 0x409   :  { %v722_v20 = vpop.f32.mrb[8].mxu0 }
 0x40a   :  { %v723_v52 = vadd.f32 %v722_v20, %v633_v0  ;;  %v1951_v53 = vpop.f32.mrb[9].mxu0  ;;  %v2326_v0 = vld [vmem:[%s2932_s3 + $0x24] ss:$8 sps:$4 sm:$0xff]  }
 0x40b   :  { %v725_v27 = vpop.f32.mrb[10].mxu0  ;;  %v2332_v20 = vld [vmem:[%s2932_s3 + $0x44] ss:$8 sps:$4 sm:$0xff]   ;;  %v2335_v53 = vld [vmem:[%s2932_s3 + $0x54] ss:$8 sps:$4 sm:$0xff]  }
 0x40c   :  { %v726_v54 = vadd.f32 %v725_v27, %v636_v14  ;;  %v1952_v55 = vpop.f32.mrb[11].mxu0  ;;  %v2329_v14 = vld [vmem:[%s2932_s3 + $0x34] ss:$8 sps:$4 sm:$0xff]   ;;  %v2333_v27 = vld [vmem:[%s2932_s3 + $0x50] ss:$8 sps:$4 sm:$0xff]  }
 0x40d   :  { %v2336_v55 = vld [vmem:[%s2932_s3 + $0x60] ss:$8 sps:$4 sm:$0xff]  }
 0x424   :  { %v828_v56 = vpop.f32.mrb[8].mxu1 }
 0x425   :  { %v835_v33 = vadd.f32 %v828_v56, %v723_v52  ;;  %v1971_v57 = vpop.f32.mrb[9].mxu1  ;;  %v2330_v52 = vld [vmem:[%s2932_s3 + $0x40] ss:$8 sps:$4 sm:$0xff]   ;;  %v2341_v56 = vld [vmem:[%s2932_s3 + $0x74] ss:$8 sps:$4 sm:$0xff]  }
 0x426   :  { %v831_v1 = vpop.f32.mrb[10].mxu1  ;;  %v1262_v57 = vld [vmem:[#allocation7 + $0x18] sm:$0xff] }
 0x427   :  { %v842_v58 = vadd.f32 %v1699_v30, %v835_v33  ;;  %v836_v36 = vadd.f32 %v831_v1, %v726_v54  ;;  %v1972_v60 = vpop.f32.mrb[11].mxu1  ;;  %v2338_v54 = vld [vmem:[%s2932_s3 + $0x64] ss:$8 sps:$4 sm:$0xff]  }
 0x428   :  { %v1260_v33 = vld [vmem:[#allocation7 + $0x8] sm:$0xff]  ;;  %v1259_v1 = vld [vmem:[#allocation7] sm:$0xff] }
 0x429   :  { %v846_v61 = vrot.slane %v842_v58, 4  ;;  %v843_v62 = vadd.f32 %v1699_v30, %v836_v36  ;;  %v2339_v30 = vld [vmem:[%s2932_s3 + $0x70] ss:$8 sps:$4 sm:$0xff]   ;;  %v1264_v60 = vld [vmem:[#allocation7 + $0x28] sm:$0xff] }
 0x42a   :  { %v1261_v36 = vld [vmem:[#allocation7 + $0x10] sm:$0xff] }
 0x42b   :  { %v847_v63 = vadd.f32 %v846_v61, %v842_v58  ;;  %v852_v2 = vrot.slane %v843_v62, 4  ;;  %v1266_v61 = vld [vmem:[#allocation7 + $0x38] sm:$0xff] }
 0x42d   :  { %v848_v5 = vrot.slane %v847_v63, 2  ;;  %v853_v6 = vadd.f32 %v852_v2, %v843_v62  ;;  %v1263_v2 = vld [vmem:[#allocation7 + $0x20] sm:$0xff] }
 0x42f   :  { %v849_v8 = vadd.f32 %v848_v5, %v847_v63  ;;  %v854_v9 = vrot.slane %v853_v6, 2  ;;  %v2816_v63 = vpack.c.bf16 %v1266_v61, %v1264_v60  ;;  %v1265_v5 = vld [vmem:[#allocation7 + $0x30] sm:$0xff] }
 0x430   :  { %v1301_v60 = vld [vmem:[#allocation7 + $0x150] sm:$0xff] }
 0x431   :  { %v855_v11 = vadd.f32 %v854_v9, %v853_v6  ;;  %v850_v12 = vrot.slane %v849_v8, 1  ;;  %v1268_v6 = vld [vmem:[#allocation7 + $0x48] sm:$0xff]  ;;  %v2819_v9 = vpack.c.bf16 %v1265_v5, %v1263_v2 }
 0x433   :  { %v856_v13 = vrot.slane %v855_v11, 1  ;;  %v851_v15 = vadd.f32 %v850_v12, %v849_v8  ;;  %v1270_v8 = vld [vmem:[#allocation7 + $0x58] sm:$0xff]  ;;  %v1267_v12 = vld [vmem:[#allocation7 + $0x40] sm:$0xff] }
 0x435   :  { %v857_v19 = vadd.f32 %v856_v13, %v855_v11  ;;  %v2822_v11 = vpack.c.bf16 %v1270_v8, %v1268_v6  ;;  %v1269_v13 = vld [vmem:[#allocation7 + $0x50] sm:$0xff] }
 0x437   :  { %v860_v21 = vsel %vm233_vm1, %v857_v19, %v851_v15  ;;  %v1272_v15 = vld [vmem:[#allocation7 + $0x68] sm:$0xff]  ;;  %v1274_v19 = vld [vmem:[#allocation7 + $0x78] sm:$0xff] }
 0x438   :  { %2006 = vmatmul.mubr.f32.vlgmr.msra.gmra.mrb[6].mxu0 %v860_v21  ;;  %v2825_v21 = vpack.c.bf16 %v1269_v13, %v1267_v12  ;;  %v844_v13 = vld [vmem:[%s2933_s4 + $0x4] sm:$0x1] }
 0x439   :  { %1244 = vmatprep.mubr.bf16.mxu0 %v2458_v59  ;;  %1213 = vmatpush1.bf16.msra.mxu0 %v2318_v22  ;;  %v2828_v22 = vpack.c.bf16 %v1274_v19, %v1272_v15 }
 0x43a   :  { %1214 = vmatprep.subr.bf16.mxu0 %v2323_v50  ;;  %v1287_v50 = vld [vmem:[#allocation7 + $0xe0] sm:$0xff] }
 0x43d   :  { %1215 = vmatpush1.bf16.msra.mxu0 %v2321_v51  ;;  %v1289_v51 = vld [vmem:[#allocation7 + $0xf0] sm:$0xff] }
 0x43e   :  { %1216 = vmatprep.subr.bf16.mxu0 %v2326_v0  ;;  %v1292_v0 = vld [vmem:[#allocation7 + $0x108] sm:$0xff] }
 0x441   :  { %1217 = vmatpush1.bf16.msra.mxu0 %v2324_v10  ;;  %v1294_v10 = vld [vmem:[#allocation7 + $0x118] sm:$0xff] }
 0x442   :  { %1218 = vmatprep.subr.bf16.mxu0 %v2329_v14  ;;  %v2169_v14 = vpack.c.bf16 %v1289_v51, %v1287_v50  ;;  %v1315_v50 = vld [vmem:[#allocation7 + $0x1c0] sm:$0xff]  ;;  %v1317_v51 = vld [vmem:[#allocation7 + $0x1d0] sm:$0xff] }
 0x445   :  { %1219 = vmatpush1.bf16.msra.mxu0 %v2327_v18  ;;  %v2171_v18 = vpack.c.bf16 %v1294_v10, %v1292_v0  ;;  %v2197_v0 = vpack.c.bf16 %v1317_v51, %v1315_v50  ;;  %v1320_v10 = vld [vmem:[#allocation7 + $0x1e8] sm:$0xff] }
 0x446   :  { %1220 = vmatprep.subr.bf16.mxu0 %v2332_v20  ;;  %v1291_v20 = vld [vmem:[#allocation7 + $0x100] sm:$0xff] }
 0x449   :  { %1221 = vmatpush1.bf16.msra.mxu0 %v2330_v52  ;;  %v1293_v52 = vld [vmem:[#allocation7 + $0x110] sm:$0xff] }
 0x44a   :  { %1222 = vmatprep.subr.bf16.mxu0 %v2335_v53  ;;  %v1296_v53 = vld [vmem:[#allocation7 + $0x128] sm:$0xff] }
 0x44d   :  { %1223 = vmatpush1.bf16.msra.mxu0 %v2333_v27  ;;  %v1298_v27 = vld [vmem:[#allocation7 + $0x138] sm:$0xff] }
 0x44e   :  { %1224 = vmatprep.subr.bf16.mxu0 %v2338_v54  ;;  %v2173_v54 = vpack.c.bf16 %v1293_v52, %v1291_v20  ;;  %v1321_v52 = vld [vmem:[#allocation7 + $0x1f0] sm:$0xff] }
 0x451   :  { %1225 = vmatpush1.bf16.msra.mxu0 %v2336_v55  ;;  %v2175_v55 = vpack.c.bf16 %v1298_v27, %v1296_v53  ;;  %v1120_v27 = vld [vmem:[%s2934_s5] ss:$4 sm:$0x3] }
 0x452   :  { %1226 = vmatprep.subr.bf16.mxu0 %v2341_v56  ;;  %v1295_v56 = vld [vmem:[#allocation7 + $0x120] sm:$0xff] }
 0x455   :  { %1227 = vmatpush1.bf16.msra.mxu0 %v2339_v30  ;;  %v1297_v30 = vld [vmem:[#allocation7 + $0x130] sm:$0xff] }
 0x50b   :  { %v928_v24 = vpop.f32.mrb[6].mxu0 }
 0x50c   :  { %v939_v25 = vrot.slane %v928_v24, %v2651_v4  ;;  %v2007_v26 = vpop.f32.mrb[7].mxu0  ;;  %v1273_v24 = vld [vmem:[#allocation7 + $0x70] sm:$0xff] }
 0x50d   :  { %v1278_v26 = vld [vmem:[#allocation7 + $0x98] sm:$0xff] }
 0x50e   :  { %v940_v28 = vcombine.high %v939_v25, %v939_v25  ;;  %v947_v29 = vrot.slane %v939_v25, %v2651_v4  ;;  %v1276_v25 = vld [vmem:[#allocation7 + $0x88] sm:$0xff] }
 0x510   :  { %v954_v31 = vrot.slane %v940_v28, %v2651_v4  ;;  %v958_v59 = vrot.slane %v947_v29, %v2655_v7  ;;  %v2831_v28 = vpack.c.bf16 %v1273_v24, %v1271_v23  ;;  %v2834_v29 = vpack.c.bf16 %v1278_v26, %v1276_v25 }
 0x512   :  { %v962_v32 = vrot.slane %v954_v31, %v2655_v7  ;;  %v2763_v34 = vsub.f32 %v842_v58, %v958_v59  ;;  %v2139_v58 = vpack.c.bf16 %v1262_v57, %v1260_v33  ;;  %v1275_v31 = vld [vmem:[#allocation7 + $0x80] sm:$0xff]  ;;  %v1277_v59 = vld [vmem:[#allocation7 + $0x90] sm:$0xff]  ;;  %v1300_v33 = vld [vmem:[#allocation7 + $0x148] sm:$0xff] }
 0x513   :  { %v1302_v57 = vld [vmem:[#allocation7 + $0x158] sm:$0xff] }
 0x514   :  { %v2765_v35 = vsub.f32 %v843_v62, %v962_v32  ;;  %v967_v16 = vmul.f32 %v2763_v34, %v2763_v34  ;;  %v2814_v62 = vpack.c.bf16 %v1261_v36, %v1259_v1  ;;  %2140 = vmatprep.subr.bf16.mxu1 %v2139_v58  ;;  %2204 = vmatprep.subr.bf16.mxu0 %v2139_v58  ;;  %v1280_v32 = vld [vmem:[#allocation7 + $0xa8] sm:$0xff]  ;;  %v1299_v36 = vld [vmem:[#allocation7 + $0x140] sm:$0xff] }
 0x515   :  { %v2177_v1 = vpack.c.bf16 %v1297_v30, %v1295_v56  ;;  %v2179_v58 = vpack.c.bf16 %v1302_v57, %v1300_v33  ;;  %v2181_v61 = vpack.c.bf16 %v1301_v60, %v1299_v36 }
 0x516   :  { %v968_v17 = vmul.f32 %v2765_v35, %v2765_v35  ;;  %v969_v37 = vrot.slane %v967_v16, 4 }
 0x518   :  { %v970_v38 = vadd.f32 %v969_v37, %v967_v16  ;;  %v975_v39 = vrot.slane %v968_v17, 4  ;;  %v1282_v16 = vld [vmem:[#allocation7 + $0xb8] sm:$0xff] }
 0x519   :  { %v2840_v37 = vpack.c.bf16 %v1282_v16, %v1280_v32  ;;  %v1700_v32 = vld [vmem:[%s2933_s4 + $0x5] ss:$0 sm:$0xff] }
 0x51a   :  { %v971_v40 = vrot.slane %v970_v38, 2  ;;  %v976_v41 = vadd.f32 %v975_v39, %v968_v17  ;;  %v2837_v17 = vpack.c.bf16 %v1277_v59, %v1275_v31  ;;  %v1281_v39 = vld [vmem:[#allocation7 + $0xb0] sm:$0xff] }
 0x51c   :  { %v972_v42 = vadd.f32 %v971_v40, %v970_v38  ;;  %v977_v43 = vrot.slane %v976_v41, 2  ;;  %v1279_v38 = vld [vmem:[#allocation7 + $0xa0] sm:$0xff]  ;;  %v1284_v40 = vld [vmem:[#allocation7 + $0xc8] sm:$0xff] }
 0x51e   :  { %v973_v44 = vrot.slane %v972_v42, 1  ;;  %v978_v45 = vadd.f32 %v977_v43, %v976_v41  ;;  %v1286_v41 = vld [vmem:[#allocation7 + $0xd8] sm:$0xff] }
 0x51f   :  { %v2846_v43 = vpack.c.bf16 %v1286_v41, %v1284_v40  ;;  %v1312_v41 = vld [vmem:[#allocation7 + $0x1a8] sm:$0xff] }
 0x520   :  { %v979_v46 = vrot.slane %v978_v45, 1  ;;  %v974_v47 = vadd.f32 %v973_v44, %v972_v42  ;;  %v2843_v42 = vpack.c.bf16 %v1281_v39, %v1279_v38  ;;  %v1283_v44 = vld [vmem:[#allocation7 + $0xc0] sm:$0xff] }
 0x522   :  { %v980_v48 = vadd.f32 %v979_v46, %v978_v45  ;;  %v1285_v45 = vld [vmem:[#allocation7 + $0xd0] sm:$0xff]  ;;  %v1288_v46 = vld [vmem:[#allocation7 + $0xe8] sm:$0xff] }
 0x524   :  { %v983_v49 = vsel %vm233_vm1, %v980_v48, %v974_v47  ;;  %v1290_v47 = vld [vmem:[#allocation7 + $0xf8] sm:$0xff]  ;;  %v2849_v48 = vpack.c.bf16 %v1285_v45, %v1283_v44  ;;  %v1311_v44 = vld [vmem:[#allocation7 + $0x1a0] sm:$0xff]  ;;  %v1313_v45 = vld [vmem:[#allocation7 + $0x1b0] sm:$0xff] }
 0x525   :  { %2041 = vmatmul.mubr.f32.vlgmr.msra.gmra.mrb[2].mxu1 %v983_v49  ;;  %v2852_v49 = vpack.c.bf16 %v1290_v47, %v1288_v46  ;;  %v2193_v46 = vpack.c.bf16 %v1313_v45, %v1311_v44  ;;  %v1316_v47 = vld [vmem:[#allocation7 + $0x1c8] sm:$0xff] }
 0x526   :  { %2142 = vmatpush1.bf16.msra.mxu1 %v2814_v62 }
 0x527   :  { %2144 = vmatprep.subr.bf16.mxu1 %v2816_v63 }
 0x52a   :  { %2146 = vmatpush1.bf16.msra.mxu1 %v2819_v9 }
 0x52b   :  { %2148 = vmatprep.subr.bf16.mxu1 %v2822_v11 }
 0x52e   :  { %2150 = vmatpush1.bf16.msra.mxu1 %v2825_v21 }
 0x52f   :  { %2152 = vmatprep.subr.bf16.mxu1 %v2828_v22 }
 0x532   :  { %2154 = vmatpush1.bf16.msra.mxu1 %v2831_v28 }
 0x533   :  { %2156 = vmatprep.subr.bf16.mxu1 %v2834_v29 }
 0x536   :  { %2158 = vmatpush1.bf16.msra.mxu1 %v2837_v17 }
 0x537   :  { %2160 = vmatprep.subr.bf16.mxu1 %v2840_v37 }
 0x53a   :  { %2162 = vmatpush1.bf16.msra.mxu1 %v2843_v42 }
 0x53b   :  { %2164 = vmatprep.subr.bf16.mxu1 %v2846_v43 }
 0x53e   :  { %2166 = vmatpush1.bf16.msra.mxu1 %v2849_v48 }
 0x53f   :  { %2168 = vmatprep.subr.bf16.mxu1 %v2852_v49 }
 0x542   :  { %2170 = vmatpush1.bf16.msra.mxu1 %v2169_v14 }
 0x543   :  { %2172 = vmatprep.subr.bf16.mxu1 %v2171_v18 }
 0x546   :  { %2174 = vmatpush1.bf16.msra.mxu1 %v2173_v54 }
 0x547   :  { %2176 = vmatprep.subr.bf16.mxu1 %v2175_v55 }
 0x54a   :  { %2178 = vmatpush1.bf16.msra.mxu1 %v2177_v1 }
 0x54b   :  { %2180 = vmatprep.subr.bf16.mxu1 %v2179_v58 }
 0x54e   :  { %2182 = vmatpush1.bf16.msra.mxu1 %v2181_v61 }
 0x5f8   :  { %v1051_v2 = vpop.f32.mrb[2].mxu1 }
 0x5f9   :  { %v1052_v5 = vadd.f32 1e-05, %v1051_v2  ;;  %v2042_v6 = vpop.f32.mrb[3].mxu1 }
 0x5fb   :  { %2344 = vrsqrt.f32 %v1052_v5 }
 0x605   :  { %v2345_v8 = vpop.eup %2344 }
 0x606   :  { %v1063_v12 = vrot.slane %v2345_v8, %v2651_v4 }
 0x608   :  { %v1064_v15 = vcombine.high %v1063_v12, %v1063_v12  ;;  %v1071_v19 = vrot.slane %v1063_v12, %v2651_v4 }
 0x60a   :  { %v1078_v23 = vrot.slane %v1064_v15, %v2651_v4  ;;  %v1081_v24 = vmul.f32 %v1071_v19, %v844_v13 }
 0x60c   :  { %v1082_v25 = vmul.f32 %v1078_v23, %v844_v13  ;;  %v1088_v26 = vrot.slane %v1081_v24, %v2655_v7 }
 0x60e   :  { %v1092_v31 = vrot.slane %v1082_v25, %v2655_v7  ;;  %v1095_v59 = vmul.f32 %v1088_v26, %v2763_v34  ;;  %v1304_v34 = vld [vmem:[#allocation7 + $0x168] sm:$0xff] }
 0x610   :  { %v1096_v16 = vmul.f32 %v1092_v31, %v2765_v35  ;;  %v1101_v38 = vadd.f32 %v1700_v32, %v1095_v59  ;;  %v1306_v35 = vld [vmem:[#allocation7 + $0x178] sm:$0xff] }
 0x612   :  { %v1102_v39 = vadd.f32 %v1700_v32, %v1096_v16 }
 0x614   :  { %v1103_v40 = vpack.c.bf16 %v1102_v39, %v1101_v38 }
 0x616   :  { %1245 = vmatmul.mubr.bf16.vlgmr.msra.gmra.mrb[12].mxu0 %v1103_v40 }
 0x617   :  { %2206 = vmatpush1.bf16.msra.mxu0 %v2814_v62  ;;  %v2183_v62 = vpack.c.bf16 %v1306_v35, %v1304_v34 }
 0x618   :  { %2208 = vmatprep.subr.bf16.mxu0 %v2816_v63  ;;  %v1303_v63 = vld [vmem:[#allocation7 + $0x160] sm:$0xff] }
 0x619   :  { %2184 = vmatprep.subr.bf16.mxu1 %v2183_v62 }
 0x61b   :  { %2210 = vmatpush1.bf16.msra.mxu0 %v2819_v9  ;;  %v1305_v9 = vld [vmem:[#allocation7 + $0x170] sm:$0xff] }
 0x61c   :  { %2212 = vmatprep.subr.bf16.mxu0 %v2822_v11  ;;  %v2185_v11 = vpack.c.bf16 %v1305_v9, %v1303_v63 }
 0x61e   :  { %2186 = vmatpush1.bf16.msra.mxu1 %v2185_v11 }
 0x61f   :  { %2214 = vmatpush1.bf16.msra.mxu0 %v2825_v21  ;;  %v1308_v21 = vld [vmem:[#allocation7 + $0x188] sm:$0xff] }
 0x620   :  { %2216 = vmatprep.subr.bf16.mxu0 %v2828_v22  ;;  %v1310_v22 = vld [vmem:[#allocation7 + $0x198] sm:$0xff] }
 0x623   :  { %2218 = vmatpush1.bf16.msra.mxu0 %v2831_v28  ;;  %v2187_v28 = vpack.c.bf16 %v1310_v22, %v1308_v21 }
 0x624   :  { %2220 = vmatprep.subr.bf16.mxu0 %v2834_v29  ;;  %v1307_v29 = vld [vmem:[#allocation7 + $0x180] sm:$0xff] }
 0x625   :  { %2188 = vmatprep.subr.bf16.mxu1 %v2187_v28 }
 0x627   :  { %2222 = vmatpush1.bf16.msra.mxu0 %v2837_v17  ;;  %v1309_v17 = vld [vmem:[#allocation7 + $0x190] sm:$0xff] }
 0x628   :  { %2224 = vmatprep.subr.bf16.mxu0 %v2840_v37  ;;  %v2189_v37 = vpack.c.bf16 %v1309_v17, %v1307_v29 }
 0x62a   :  { %2190 = vmatpush1.bf16.msra.mxu1 %v2189_v37 }
 0x62b   :  { %2226 = vmatpush1.bf16.msra.mxu0 %v2843_v42  ;;  %v1314_v42 = vld [vmem:[#allocation7 + $0x1b8] sm:$0xff] }
 0x62c   :  { %2228 = vmatprep.subr.bf16.mxu0 %v2846_v43  ;;  %v2191_v43 = vpack.c.bf16 %v1314_v42, %v1312_v41 }
 0x62e   :  { %2192 = vmatprep.subr.bf16.mxu1 %v2191_v43 }
 0x62f   :  { %2230 = vmatpush1.bf16.msra.mxu0 %v2849_v48  ;;  %2194 = vmatpush1.bf16.msra.mxu1 %v2193_v46  ;;  %v1318_v48 = vld [vmem:[#allocation7 + $0x1d8] sm:$0xff] }
 0x630   :  { %2232 = vmatprep.subr.bf16.mxu0 %v2852_v49  ;;  %v2195_v49 = vpack.c.bf16 %v1318_v48, %v1316_v47 }
 0x632   :  { %2196 = vmatprep.subr.bf16.mxu1 %v2195_v49 }
 0x633   :  { %2234 = vmatpush1.bf16.msra.mxu0 %v2169_v14  ;;  %2198 = vmatpush1.bf16.msra.mxu1 %v2197_v0  ;;  %v1322_v14 = vld [vmem:[#allocation7 + $0x1f8] sm:$0xff] }
 0x634   :  { %2236 = vmatprep.subr.bf16.mxu0 %v2171_v18  ;;  %v1319_v18 = vld [vmem:[#allocation7 + $0x1e0] sm:$0xff]  ;;  %v2199_v20 = vpack.c.bf16 %v1322_v14, %v1320_v10 }
 0x635   :  { %v2201_v53 = vpack.c.bf16 %v1321_v52, %v1319_v18 }
 0x636   :  { %2200 = vmatprep.subr.bf16.mxu1 %v2199_v20 }
 0x637   :  { %2238 = vmatpush1.bf16.msra.mxu0 %v2173_v54  ;;  %2202 = vmatpush1.bf16.msra.mxu1 %v2201_v53  ;;  %v2887_v54 = vsub.s32 1, %v2648_v3 }
 0x638   :  { %2240 = vmatprep.subr.bf16.mxu0 %v2175_v55  ;;  %v1125_v55 = vrot.slane %v1120_v27, %v2655_v7 }
 0x639   :  { %v1129_v56 = vrot.slane %v1120_v27, %v2887_v54 }
 0x63b   :  { %2242 = vmatpush1.bf16.msra.mxu0 %v2177_v1 }
 0x63c   :  { %2244 = vmatprep.subr.bf16.mxu0 %v2179_v58 }
 0x63f   :  { %2246 = vmatpush1.bf16.msra.mxu0 %v2181_v61 }
 0x640   :  { %2248 = vmatprep.subr.bf16.mxu0 %v2183_v62 }
 0x643   :  { %2250 = vmatpush1.bf16.msra.mxu0 %v2185_v11 }
 0x644   :  { %2252 = vmatprep.subr.bf16.mxu0 %v2187_v28 }
 0x647   :  { %2254 = vmatpush1.bf16.msra.mxu0 %v2189_v37 }
 0x648   :  { %2256 = vmatprep.subr.bf16.mxu0 %v2191_v43 }
 0x64b   :  { %2258 = vmatpush1.bf16.msra.mxu0 %v2193_v46 }
 0x64c   :  { %2260 = vmatprep.subr.bf16.mxu0 %v2195_v49 }
 0x64f   :  { %2262 = vmatpush1.bf16.msra.mxu0 %v2197_v0 }
 0x650   :  { %2264 = vmatprep.subr.bf16.mxu0 %v2199_v20 }
 0x653   :  { %2266 = vmatpush1.bf16.msra.mxu0 %v2201_v53 }
 0x6e9   :  { %v1246_v30 = vpop.f32.mrb[12].mxu0 }
 0x6ea   :  { %v1247_v33 = vadd.f32 %v1246_v30, %v1125_v55  ;;  %v1248_v57 = vpop.f32.mrb[13].mxu0 }
 0x6eb   :  { %v1249_v1 = vadd.f32 %v1248_v57, %v1129_v56  ;;  %v1250_v58 = vpop.f32.mrb[14].mxu0 }
 0x6ec   :  { %v1323_v36 = vrot.slane %v1247_v33, 4  ;;  %v1251_v60 = vadd.f32 %v1250_v58, %v1125_v55  ;;  %v1252_v61 = vpop.f32.mrb[15].mxu0 }
 0x6ed   :  { %v1329_v2 = vrot.slane %v1249_v1, 4  ;;  %v1253_v5 = vadd.f32 %v1252_v61, %v1129_v56 }
 0x6ee   :  { %v1324_v6 = vadd.f32 %v1323_v36, %v1247_v33  ;;  %v1335_v8 = vrot.slane %v1251_v60, 4 }
 0x6ef   :  { %v1330_v12 = vadd.f32 %v1329_v2, %v1249_v1  ;;  %v1341_v13 = vrot.slane %v1253_v5, 4 }
 0x6f0   :  { %v1325_v3 = vrot.slane %v1324_v6, 2  ;;  %v1336_v15 = vadd.f32 %v1335_v8, %v1251_v60 }
 0x6f1   :  { %v1331_v19 = vrot.slane %v1330_v12, 2  ;;  %v1342_v23 = vadd.f32 %v1341_v13, %v1253_v5 }
 0x6f2   :  { %v1326_v24 = vadd.f32 %v1325_v3, %v1324_v6  ;;  %v1337_v25 = vrot.slane %v1336_v15, 2 }
 0x6f3   :  { %v1332_v26 = vadd.f32 %v1331_v19, %v1330_v12  ;;  %v1343_v31 = vrot.slane %v1342_v23, 2 }
 0x6f4   :  { %v1338_v59 = vadd.f32 %v1337_v25, %v1336_v15  ;;  %v1327_v38 = vrot.slane %v1326_v24, 1 }
 0x6f5   :  { %v1344_v32 = vadd.f32 %v1343_v31, %v1342_v23  ;;  %v1333_v16 = vrot.slane %v1332_v26, 1 }
 0x6f6   :  { %v1339_v39 = vrot.slane %v1338_v59, 1  ;;  %v1328_v63 = vadd.f32 %v1327_v38, %v1326_v24 }
 0x6f7   :  { %v1345_v40 = vrot.slane %v1344_v32, 1  ;;  %v1334_v35 = vadd.f32 %v1333_v16, %v1332_v26 }
 0x6f8   :  { %v1340_v34 = vadd.f32 %v1339_v39, %v1338_v59  ;;  %v1717_v39 = vld [vmem:[%s2934_s5 + $0x1] ss:$4 sm:$0x3] }
 0x6f9   :  { %v1346_v62 = vadd.f32 %v1345_v40, %v1344_v32  ;;  %v1718_v40 = vld [vmem:[%s2934_s5 + $0x2] ss:$4 sm:$0x3] }
 0x6fa   :  { %v1351_v11 = vsel %vm233_vm1, %v1340_v34, %v1328_v63 }
 0x6fb   :  { %v1352_v9 = vsel %vm233_vm1, %v1346_v62, %v1334_v35 }
 0x6fc   :  { %1419 = vmatprep.mubr.f32.mxu1 %v1352_v9  ;;  %v1643_v9 = vrot.slane %v1718_v40, %v2655_v7 }
 0x6fd   :  { %1420 = vmatmul.mubr.f32.vlgmr.msra.gmra.mrb[12].mxu1 %v1351_v11 }
 0x7d0   :  { %v1421_v21 = vpop.f32.mrb[12].mxu1 }
 0x7d1   :  { %v1423_v22 = vpop.f32.mrb[13].mxu1 }
 0x7d2   :  { %v1428_v28 = vcombine.low %v1421_v21, %v1423_v22 }
 0x7d4   :  { %v1435_v29 = vrot.slane %v1428_v28, %v2651_v4  ;;  %v1647_v28 = vrot.slane %v1718_v40, %v2887_v54 }
 0x7d6   :  { %v1436_v17 = vcombine.high %v1435_v29, %v1435_v29  ;;  %v1443_v37 = vrot.slane %v1435_v29, %v2651_v4 }
 0x7d8   :  { %v1450_v41 = vrot.slane %v1436_v17, %v2651_v4  ;;  %v1454_v42 = vrot.slane %v1443_v37, %v2655_v7  ;;  %v1458_v43 = vrot.slane %v1443_v37, %v2887_v54 }
 0x7da   :  { %v1462_v44 = vrot.slane %v1450_v41, %v2655_v7  ;;  %v1466_v45 = vrot.slane %v1450_v41, %v2887_v54  ;;  %v1471_v46 = vsub.f32 %v1247_v33, %v1454_v42  ;;  %v1472_v47 = vsub.f32 %v1249_v1, %v1458_v43 }
 0x7dc   :  { %v1473_v48 = vsub.f32 %v1251_v60, %v1462_v44  ;;  %v1474_v49 = vsub.f32 %v1253_v5, %v1466_v45  ;;  %v1475_v50 = vmul.f32 %v1471_v46, %v1471_v46  ;;  %v1476_v51 = vmul.f32 %v1472_v47, %v1472_v47 }
 0x7de   :  { %v1477_v0 = vmul.f32 %v1473_v48, %v1473_v48  ;;  %v1479_v10 = vrot.slane %v1475_v50, 4  ;;  %v1478_v14 = vmul.f32 %v1474_v49, %v1474_v49  ;;  %v1485_v18 = vrot.slane %v1476_v51, 4 }
 0x7e0   :  { %v1486_v20 = vadd.f32 %v1485_v18, %v1476_v51  ;;  %v1497_v52 = vrot.slane %v1478_v14, 4  ;;  %v1480_v53 = vadd.f32 %v1479_v10, %v1475_v50  ;;  %v1491_v27 = vrot.slane %v1477_v0, 4 }
 0x7e2   :  { %v1487_v55 = vrot.slane %v1486_v20, 2  ;;  %v1498_v56 = vadd.f32 %v1497_v52, %v1478_v14  ;;  %v1481_v30 = vrot.slane %v1480_v53, 2  ;;  %v1492_v57 = vadd.f32 %v1491_v27, %v1477_v0 }
 0x7e4   :  { %v1488_v58 = vadd.f32 %v1487_v55, %v1486_v20  ;;  %v1499_v36 = vrot.slane %v1498_v56, 2  ;;  %v1482_v33 = vadd.f32 %v1481_v30, %v1480_v53  ;;  %v1493_v1 = vrot.slane %v1492_v57, 2 }
 0x7e6   :  { %v1489_v60 = vrot.slane %v1488_v58, 1  ;;  %v1500_v61 = vadd.f32 %v1499_v36, %v1498_v56  ;;  %v1483_v2 = vrot.slane %v1482_v33, 1  ;;  %v1494_v5 = vadd.f32 %v1493_v1, %v1492_v57 }
 0x7e8   :  { %v1501_v6 = vrot.slane %v1500_v61, 1  ;;  %v1495_v8 = vrot.slane %v1494_v5, 1  ;;  %v1490_v12 = vadd.f32 %v1489_v60, %v1488_v58  ;;  %v1484_v3 = vadd.f32 %v1483_v2, %v1482_v33 }
 0x7ea   :  { %v1502_v13 = vadd.f32 %v1501_v6, %v1500_v61  ;;  %v1496_v15 = vadd.f32 %v1495_v8, %v1494_v5 }
 0x7ec   :  { %v1508_v19 = vsel %vm233_vm1, %v1502_v13, %v1490_v12  ;;  %v1507_v23 = vsel %vm233_vm1, %v1496_v15, %v1484_v3 }
 0x7ed   :  { %1575 = vmatprep.mubr.f32.mxu0 %v1508_v19 }
 0x7ee   :  { %1576 = vmatmul.mubr.f32.vlgmr.msra.gmra.mrb[16].mxu0 %v1507_v23 }
 0x8c1   :  { %v1577_v24 = vpop.f32.mrb[16].mxu0 }
 0x8c2   :  { %v1578_v25 = vadd.f32 1e-05, %v1577_v24  ;;  %v1579_v26 = vpop.f32.mrb[17].mxu0 }
 0x8c3   :  { %v1580_v31 = vadd.f32 1e-05, %v1579_v26 }
 0x8c4   :  { %2346 = vrsqrt.f32 %v1578_v25 }
 0x8c5   :  { %2348 = vrsqrt.f32 %v1580_v31 }
 0x8ce   :  { %v2347_v59 = vpop.eup %2346 }
 0x8cf   :  { %v2349_v32 = vpop.eup %2348 }
 0x8d0   :  { %v1586_v16 = vcombine.low %v2347_v59, %v2349_v32 }
 0x8d2   :  { %v1593_v38 = vrot.slane %v1586_v16, %v2651_v4 }
 0x8d4   :  { %v1594_v34 = vcombine.high %v1593_v38, %v1593_v38  ;;  %v1601_v35 = vrot.slane %v1593_v38, %v2651_v4 }
 0x8d6   :  { %v1608_v62 = vrot.slane %v1594_v34, %v2651_v4  ;;  %v1611_v63 = vmul.f32 %v1717_v39, %v1601_v35 }
 0x8d8   :  { %v1612_v11 = vmul.f32 %v1717_v39, %v1608_v62  ;;  %v1618_v21 = vrot.slane %v1611_v63, %v2655_v7  ;;  %v1622_v22 = vrot.slane %v1611_v63, %v2887_v54 }
 0x8da   :  { %v1626_v29 = vrot.slane %v1612_v11, %v2655_v7  ;;  %v1630_v17 = vrot.slane %v1612_v11, %v2887_v54  ;;  %v1635_v37 = vmul.f32 %v1618_v21, %v1471_v46  ;;  %v1636_v41 = vmul.f32 %v1622_v22, %v1472_v47 }
 0x8dc   :  { %v1637_v42 = vmul.f32 %v1626_v29, %v1473_v48  ;;  %v1638_v43 = vmul.f32 %v1630_v17, %v1474_v49  ;;  %v1650_v44 = vadd.f32 %v1643_v9, %v1635_v37  ;;  %v1651_v4 = vadd.f32 %v1647_v28, %v1636_v41 }
 0x8de   :  { %v1652_v45 = vadd.f32 %v1643_v9, %v1637_v42  ;;  %v1653_v50 = vadd.f32 %v1647_v28, %v1638_v43  ;;  %1654 = vst [vmem:[%s2938_s9] sm:$0xff] %v1650_v44  ;;  %1655 = vst [vmem:[%s2938_s9 + $0x8] sm:$0xff] %v1651_v4 }
 0x8e0   :  { %1656 = vst [vmem:[%s2938_s9 + $0x10] sm:$0xff] %v1652_v45  ;;  %1657 = vst [vmem:[%s2938_s9 + $0x18] sm:$0xff] %v1653_v50 }
 0x8e1   :  { %1662 = vsyncpa [#allocation3], 1 }
 0x8e2   :  { %1663 = vsyncpa [#allocation5], 1 }
 0x8e3   :  { %1664 = vsyncpa [#allocation8], 1 }

</bundles_post_ra>
